<compile_context>
chip_gen: v7x
topology: tpu7x:2x2x1
jax: 0.10.0
libtpu: 0.0.40
codegen_flags: <defaults>
</compile_context>

<pallas_src>
import functools

import numpy as np

import jax
import jax.numpy as jnp
import jax.scipy.linalg as jsl
from jax.experimental import pallas as pl
from jax.experimental.pallas import tpu as pltpu


# ----------------------------------------------------------------------------
# Weight re-packing helpers (JAX side, tiny, done once per flow per trace)
# ----------------------------------------------------------------------------

def _banded_conv_weight(w, W):
    """(F, Cc, k, k) conv weight -> (k*Cc*W, F*W) banded GEMM weight in CW lanes.

    Row index  dy*Cc*W + c*W + x'   (height tap dy, in-channel c, input column x')
    Col index  f*W + x              (out-channel f, output column x)
    Entry      w[f, c, dy, x'-x+pad] when 0 <= x'-x+pad < k else 0.  The conv's width
    zero-padding is encoded by the zeros of the band, so no padded columns are needed.
    """
    F, Cc, k, _ = w.shape
    pad = k // 2
    sel = np.zeros((k, W, W), np.float32)
    for dx in range(k):
        for x in range(W):
            xp = x + dx - pad
            if 0 <= xp < W:
                sel[dx, xp, x] = 1.0
    wT = jnp.transpose(w, (2, 3, 1, 0))                       # (dy, dx, c, f)
    Wb = jnp.einsum('dpx,edcf->ecpfx', jnp.asarray(sel), wT)  # (dy, c, x', f, x)
    return Wb.reshape(k * Cc * W, F * W)


def _blockdiag_1x1(wm, W):
    """(Cin, Cout) 1x1 weight (out = x @ wm) -> (Cin*W, Cout*W) block-diagonal, CW lanes."""
    Cin, Cout = wm.shape
    eyeW = jnp.eye(W, dtype=wm.dtype)
    return jnp.einsum('cf,xy->cxfy', wm, eyeW).reshape(Cin * W, Cout * W)


def _repeat_bias(b, W):
    """(F,) bias -> (1, F*W) row in CW lanes (lane f*W + x carries b[f])."""
    return jnp.repeat(b, W).reshape(1, -1)


# ----------------------------------------------------------------------------
# The fused per-flow kernel: ActNorm+mixer GEMM -> conv1 -> conv2 -> conv3 ->
# affine/additive coupling epilogue + per-batch coupling logdet.
# ----------------------------------------------------------------------------

def _flow_kernel(h_ref, wmix_ref, bmix_ref, w1_ref, b1_ref, w2_ref, b2_ref,
                 w3_ref, b3_ref, out_ref, ld_ref, *, H, W, C, k, affine):
    pad = k // 2
    ch2w = (C // 2) * W

    # ActNorm folded into the block-diagonal 1x1 mixer GEMM (f32 so that the
    # pass-through half h1 is emitted exactly).
    x = h_ref[0]                                                     # (H, C*W)
    hm = jnp.dot(x, wmix_ref[...], preferred_element_type=jnp.float32) + bmix_ref[...]
    h1 = hm[:, :ch2w]
    h2 = hm[:, ch2w:]

    def conv_kxk(v, w_ref, b_ref):
        # Height-pad with zero rows, concatenate the k row shifts on lanes and do a
        # single fat bf16 GEMM against the banded (width-folded) weight.
        zrow = jnp.zeros((pad, v.shape[1]), jnp.float32)
        p = jnp.concatenate([zrow, v, zrow], axis=0)                 # (H+2*pad, lanes)
        xr = jnp.concatenate([p[dy:dy + H, :] for dy in range(k)], axis=1)
        return (jnp.dot(xr.astype(jnp.bfloat16), w_ref[...],
                        preferred_element_type=jnp.float32) + b_ref[...])

    # conv1 (kxk) + ReLU
    c1 = jnp.maximum(conv_kxk(h1, w1_ref, b1_ref), 0.0)
    # conv2 (1x1, block-diagonal) + ReLU
    c2 = jnp.maximum(
        jnp.dot(c1.astype(jnp.bfloat16), w2_ref[...],
                preferred_element_type=jnp.float32) + b2_ref[...], 0.0)
    # conv3 (kxk, s|t merged, exp(3*scale) pre-folded into weight/bias)
    aux = conv_kxk(c2, w3_ref, b3_ref)

    if affine:
        z = aux[:, :ch2w] + 2.0
        t = aux[:, ch2w:]
        # stable log(sigmoid(z)); reuse s = exp(log_s) -> one EUP transcendental
        log_s = jnp.minimum(z, 0.0) - jnp.log1p(jnp.exp(-jnp.abs(z)))
        s = jnp.exp(log_s)
        out2 = s * (h2 + t)
        ld = jnp.sum(jnp.sum(log_s, axis=1, keepdims=True), axis=0, keepdims=True)
        ld_ref[0] = ld * jnp.ones((1, 128), jnp.float32)
    else:
        out2 = h2 + aux
        ld_ref[0] = jnp.zeros((1, 128), jnp.float32)

    out_ref[0] = jnp.concatenate([h1, out2], axis=1)                 # lane-dense (H, C*W)


def pallas_flow(h_cw, wmix_cw, bmix_cw, Wb1, b1r, Wd2, b2r, Wb3, b3r,
                *, H, W, C, k, affine):
    N = h_cw.shape[0]
    CW = C * W
    kernel = functools.partial(_flow_kernel, H=H, W=W, C=C, k=k, affine=affine)
    out, ld = pl.pallas_call(
        kernel,
        grid=(N,),
        in_specs=[
            pl.BlockSpec((1, H, CW), lambda n: (n, 0, 0)),
            pl.BlockSpec(wmix_cw.shape, lambda n: (0, 0)),
            pl.BlockSpec(bmix_cw.shape, lambda n: (0, 0)),
            pl.BlockSpec(Wb1.shape, lambda n: (0, 0)),
            pl.BlockSpec(b1r.shape, lambda n: (0, 0)),
            pl.BlockSpec(Wd2.shape, lambda n: (0, 0)),
            pl.BlockSpec(b2r.shape, lambda n: (0, 0)),
            pl.BlockSpec(Wb3.shape, lambda n: (0, 0)),
            pl.BlockSpec(b3r.shape, lambda n: (0, 0)),
        ],
        out_specs=[
            pl.BlockSpec((1, H, CW), lambda n: (n, 0, 0)),
            pl.BlockSpec((1, 1, 128), lambda n: (n, 0, 0)),
        ],
        out_shape=[
            jax.ShapeDtypeStruct((N, H, CW), jnp.float32),
            jax.ShapeDtypeStruct((N, 1, 128), jnp.float32),
        ],
        compiler_params=pltpu.CompilerParams(
            dimension_semantics=("parallel",),
            vmem_limit_bytes=32 * 1024 * 1024),
    )(h_cw, wmix_cw, bmix_cw, Wb1, b1r, Wd2, b2r, Wb3, b3r)
    return out, ld[:, 0, 0]


# ----------------------------------------------------------------------------
# Glow modules (forward semantics identical to the PyTorch reference)
# ----------------------------------------------------------------------------

def flow_forward(h_cw, fp, cfg, *, H, W, C):
    N = h_cw.shape[0]

    # ActNorm: data-dependent init each call (the PyTorch module is un-initialized
    # at its first forward).  Tiny per-channel reductions done in plain JAX.
    h4 = h_cw.reshape(N, H, C, W)
    mean = jnp.mean(h4, axis=(0, 1, 3))
    std = jnp.std(h4, axis=(0, 1, 3), ddof=1)                 # torch.std is unbiased
    t = -mean
    logs = jnp.log(1.0 / (std + 1e-7))
    escale = jnp.exp(logs)
    ld_act = jnp.sum(logs) * float(H * W)

    # Mixer weight; ActNorm folded in:  exp(logs)*(x+t) @ W^T == x @ Wf + bf.
    mp = fp['mixer']
    if cfg['permutation_type'] == 'conv':
        wmix = mp['w_p'] @ (mp['w_l'] * mp['l_mask'] + mp['l_eye']) @ (
            mp['w_u'] * mp['u_mask'] + jnp.diag(mp['s_sign'] * jnp.exp(mp['log_w_s'])))
        wm = wmix.T
        ld_mix = jnp.sum(mp['log_w_s']) * float(H * W)
    else:  # 'shuffle' / 'reversed': channel permutation as a tiny matmul
        wm = jnp.eye(C, dtype=jnp.float32)[mp['indices']].T
        ld_mix = jnp.zeros((), jnp.float32)
    wf = escale[:, None] * wm
    bf = (t * escale) @ wm
    wmix_cw = _blockdiag_1x1(wf, W)                           # f32 (h1 passes through verbatim)
    bmix_cw = _repeat_bias(bf, W)

    # Coupling-network weights in banded / block-diagonal GEMM form, bf16 for the MXU.
    cp = fp['coupling']
    k = cp['w1'].shape[-1]
    cs = jnp.exp(cp['scale'] * 3.0)
    w3f = cp['w3'] * cs[:, None, None, None]                  # exp(3*scale) folded in
    b3f = cp['b3'] * cs
    Wb1 = _banded_conv_weight(cp['w1'], W).astype(jnp.bfloat16)
    b1r = _repeat_bias(cp['b1'], W)
    Wd2 = _blockdiag_1x1(cp['w2'][:, :, 0, 0].T, W).astype(jnp.bfloat16)
    b2r = _repeat_bias(cp['b2'], W)
    Wb3 = _banded_conv_weight(w3f, W).astype(jnp.bfloat16)
    b3r = _repeat_bias(b3f, W)

    affine = cfg['coupling_type'] == 'affine'
    h_out, ld_cpl = pallas_flow(h_cw, wmix_cw, bmix_cw, Wb1, b1r, Wd2, b2r, Wb3, b3r,
                                H=H, W=W, C=C, k=k, affine=affine)
    return h_out, ld_act + ld_mix + ld_cpl


def squeeze_nchw(h, f):
    N, C, H, W = h.shape
    h = h.reshape(N, C, H // f, f, W // f, f)
    h = jnp.transpose(h, (0, 1, 3, 5, 2, 4))
    return h.reshape(N, C * f * f, H // f, W // f)


def glow_forward(x_nchw, params, cfg):
    N = x_nchw.shape[0]
    f = cfg['squeezing_factor']
    h = x_nchw                                                # NCHW, like PyTorch
    z_list = []
    logdet = jnp.zeros((N,), jnp.float32)
    for bp in params['blocks']:
        h = squeeze_nchw(h, f)
        _, C, H, W = h.shape
        # "CW" lane layout: rows = image rows, lanes = channel*W + column.
        # For post-squeeze shapes C*W == 128, so all kernel I/O is lane-dense.
        h_cw = jnp.transpose(h, (0, 2, 1, 3)).reshape(N, H, C * W)
        for fp in bp['flows']:
            h_cw, ld = flow_forward(h_cw, fp, cfg, H=H, W=W, C=C)
            logdet = logdet + ld
        ch = C // 2
        hk = h_cw[:, :, :ch * W].reshape(N, H, ch, W)
        z = h_cw[:, :, ch * W:].reshape(N, H, ch, W)
        z_list.append(jnp.transpose(z, (0, 2, 1, 3)).reshape(N, -1))   # NCHW flatten order
        h = jnp.transpose(hk, (0, 2, 1, 3))                            # back to NCHW
    z_list.append(h.reshape(N, -1))
    return jnp.concatenate(z_list, axis=1), logdet


# ----------------------------------------------------------------------------
# Deterministic parameter init (shapes per the PyTorch __init__)
# ----------------------------------------------------------------------------

def init_mixer_params(key, C, permutation_type):
    if permutation_type == 'conv':
        w = jax.random.normal(key, (C, C), dtype=jnp.float32)
        q, _ = jnp.linalg.qr(w)
        w_p, w_l, w_u_full = jsl.lu(q)                 # same convention as scipy.linalg.lu
        w_s = jnp.diag(w_u_full)
        w_u = jnp.triu(w_u_full, 1)
        u_mask = jnp.triu(jnp.ones((C, C), jnp.float32), 1)
        return dict(w_p=w_p, w_l=w_l, w_u=w_u, u_mask=u_mask, l_mask=u_mask.T,
                    l_eye=jnp.eye(C, dtype=jnp.float32), s_sign=jnp.sign(w_s),
                    log_w_s=jnp.log(1e-7 + jnp.abs(w_s)))
    if permutation_type == 'shuffle':
        return dict(indices=jax.random.permutation(key, C))
    return dict(indices=jnp.arange(C - 1, -1, -1))     # 'reversed'


def init_glow_params(key, num_channels, num_blocks, num_flows, squeezing_factor,
                     permutation_type, coupling_type, num_filters, kernel_size):
    params = {'blocks': []}
    C = num_channels
    for _ in range(num_blocks):
        C = C * squeezing_factor ** 2
        flows = []
        for _ in range(num_flows):
            key, k1, k2, k3, k4 = jax.random.split(key, 5)
            nin = C // 2
            nout = C if coupling_type == 'affine' else C // 2
            coupling = dict(
                w1=0.05 * jax.random.normal(k2, (num_filters, nin, kernel_size, kernel_size), jnp.float32),
                b1=jnp.zeros((num_filters,), jnp.float32),
                w2=0.05 * jax.random.normal(k3, (num_filters, num_filters, 1, 1), jnp.float32),
                b2=jnp.zeros((num_filters,), jnp.float32),
                w3=0.05 * jax.random.normal(k4, (nout, num_filters, kernel_size, kernel_size), jnp.float32),
                b3=jnp.zeros((nout,), jnp.float32),
                scale=jnp.zeros((nout,), jnp.float32),
            )
            flows.append(dict(mixer=init_mixer_params(k1, C, permutation_type),
                              coupling=coupling))
        params['blocks'].append(dict(flows=flows))
        C = C // 2
    return params


# ----------------------------------------------------------------------------

if __name__ == "__main__":
    cfg = dict(num_channels=4, num_blocks=2, num_flows=2, squeezing_factor=2,
               permutation_type='conv', coupling_type='affine',
               num_filters=32, kernel_size=3)

    key = jax.random.PRNGKey(0)
    kx, kp = jax.random.split(key)
    x = jax.random.normal(kx, (2, 4, 16, 16), dtype=jnp.float32)   # NCHW like PyTorch
    params = init_glow_params(kp, **cfg)

    fwd = jax.jit(functools.partial(glow_forward, cfg=cfg))
    z, logdet = fwd(x, params)
    z, logdet = jax.block_until_ready((z, logdet))

    assert z.shape == (2, 4 * 16 * 16), z.shape
    assert logdet.shape == (2,), logdet.shape
    assert bool(jnp.all(jnp.isfinite(z))) and bool(jnp.all(jnp.isfinite(logdet)))
    print("KERNEL_OK")
</pallas_src>

<mosaic_0001>
module attributes {stable_mosaic.version = 11 : i64} {
  func.func @_flow_kernel(%arg0: i32, %arg1: memref<1x8x128xf32, #tpu.memory_space<vmem>>, %arg2: memref<128x128xf32, #tpu.memory_space<vmem>>, %arg3: memref<1x128xf32, #tpu.memory_space<vmem>>, %arg4: memref<192x256xbf16, #tpu.memory_space<vmem>>, %arg5: memref<1x256xf32, #tpu.memory_space<vmem>>, %arg6: memref<256x256xbf16, #tpu.memory_space<vmem>>, %arg7: memref<1x256xf32, #tpu.memory_space<vmem>>, %arg8: memref<768x128xbf16, #tpu.memory_space<vmem>>, %arg9: memref<1x128xf32, #tpu.memory_space<vmem>>, %arg10: memref<1x8x128xf32, #tpu.memory_space<vmem>>, %arg11: memref<1x1x128xf32, #tpu.memory_space<vmem>>) attributes {dimension_semantics = [#tpu.dimension_semantics<parallel>], iteration_bounds = array<i64: 2>, scalar_prefetch = 0 : i64, scratch_operands = 0 : i64, tpu.core_type = #tpu.core_type<tc>, window_params = [{transform_indices = @transform_0, window_bounds = array<i64: 1, 8, 128>}, {pipeline_mode = #tpu.pipeline_mode<synchronous>, transform_indices = @transform_1, window_bounds = array<i64: 128, 128>}, {pipeline_mode = #tpu.pipeline_mode<synchronous>, transform_indices = @transform_2, window_bounds = array<i64: 1, 128>}, {pipeline_mode = #tpu.pipeline_mode<synchronous>, transform_indices = @transform_3, window_bounds = array<i64: 192, 256>}, {pipeline_mode = #tpu.pipeline_mode<synchronous>, transform_indices = @transform_4, window_bounds = array<i64: 1, 256>}, {pipeline_mode = #tpu.pipeline_mode<synchronous>, transform_indices = @transform_5, window_bounds = array<i64: 256, 256>}, {pipeline_mode = #tpu.pipeline_mode<synchronous>, transform_indices = @transform_6, window_bounds = array<i64: 1, 256>}, {pipeline_mode = #tpu.pipeline_mode<synchronous>, transform_indices = @transform_7, window_bounds = array<i64: 768, 128>}, {pipeline_mode = #tpu.pipeline_mode<synchronous>, transform_indices = @transform_8, window_bounds = array<i64: 1, 128>}, {transform_indices = @transform_9, window_bounds = array<i64: 1, 8, 128>}, {transform_indices = @transform_10, window_bounds = array<i64: 1, 1, 128>}]} {
    %c0 = arith.constant 0 : index
    %c0_0 = arith.constant 0 : index
    %c0_1 = arith.constant 0 : index
    %0 = vector.load %arg1[%c0, %c0_0, %c0_1] : memref<1x8x128xf32, #tpu.memory_space<vmem>>, vector<1x8x128xf32>
    %1 = vector.shape_cast %0 : vector<1x8x128xf32> to vector<8x128xf32>
    %c0_2 = arith.constant 0 : index
    %c0_3 = arith.constant 0 : index
    %2 = vector.load %arg2[%c0_2, %c0_3] : memref<128x128xf32, #tpu.memory_space<vmem>>, vector<128x128xf32>
    %cst = arith.constant dense<0.000000e+00> : vector<8x128xf32>
    %3 = tpu.matmul %1, %2, %cst {dimension_numbers = #tpu.dot_dimension_numbers<[1], [0], [0], [1], [0, 0, 1, 1], [], []>} : vector<8x128xf32>, vector<128x128xf32>, vector<8x128xf32> -> vector<8x128xf32>
    %c0_4 = arith.constant 0 : index
    %c0_5 = arith.constant 0 : index
    %4 = vector.load %arg3[%c0_4, %c0_5] : memref<1x128xf32, #tpu.memory_space<vmem>>, vector<1x128xf32>
    %5 = vector.broadcast %4 : vector<1x128xf32> to vector<8x128xf32>
    %6 = arith.addf %3, %5 : vector<8x128xf32>
    %7 = vector.extract_strided_slice %6 {offsets = [0, 0], sizes = [8, 64], strides = [1, 1]} : vector<8x128xf32> to vector<8x64xf32>
    %8 = vector.extract_strided_slice %6 {offsets = [0, 64], sizes = [8, 64], strides = [1, 1]} : vector<8x128xf32> to vector<8x64xf32>
    %cst_6 = arith.constant 0.000000e+00 : f32
    %9 = vector.broadcast %cst_6 : f32 to vector<1x64xf32>
    %10 = tpu.concatenate %9, %7, %9 in 0 : vector<1x64xf32>, vector<8x64xf32>, vector<1x64xf32> -> vector<10x64xf32>
    %11 = vector.extract_strided_slice %10 {offsets = [0, 0], sizes = [8, 64], strides = [1, 1]} : vector<10x64xf32> to vector<8x64xf32>
    %12 = vector.extract_strided_slice %10 {offsets = [1, 0], sizes = [8, 64], strides = [1, 1]} : vector<10x64xf32> to vector<8x64xf32>
    %13 = vector.extract_strided_slice %10 {offsets = [2, 0], sizes = [8, 64], strides = [1, 1]} : vector<10x64xf32> to vector<8x64xf32>
    %14 = tpu.concatenate %11, %12, %13 in 1 : vector<8x64xf32>, vector<8x64xf32>, vector<8x64xf32> -> vector<8x192xf32>
    %15 = arith.truncf %14 : vector<8x192xf32> to vector<8x192xbf16>
    %c0_7 = arith.constant 0 : index
    %c0_8 = arith.constant 0 : index
    %16 = vector.load %arg4[%c0_7, %c0_8] : memref<192x256xbf16, #tpu.memory_space<vmem>>, vector<192x256xbf16>
    %cst_9 = arith.constant dense<0.000000e+00> : vector<8x256xf32>
    %17 = tpu.matmul %15, %16, %cst_9 {dimension_numbers = #tpu.dot_dimension_numbers<[1], [0], [0], [1], [0, 0, 1, 1], [], []>} : vector<8x192xbf16>, vector<192x256xbf16>, vector<8x256xf32> -> vector<8x256xf32>
    %c0_10 = arith.constant 0 : index
    %c0_11 = arith.constant 0 : index
    %18 = vector.load %arg5[%c0_10, %c0_11] : memref<1x256xf32, #tpu.memory_space<vmem>>, vector<1x256xf32>
    %19 = vector.broadcast %18 : vector<1x256xf32> to vector<8x256xf32>
    %20 = arith.addf %17, %19 : vector<8x256xf32>
    %cst_12 = arith.constant 0.000000e+00 : f32
    %21 = vector.broadcast %cst_12 : f32 to vector<8x256xf32>
    %22 = arith.maximumf %20, %21 : vector<8x256xf32>
    %23 = arith.truncf %22 : vector<8x256xf32> to vector<8x256xbf16>
    %c0_13 = arith.constant 0 : index
    %c0_14 = arith.constant 0 : index
    %24 = vector.load %arg6[%c0_13, %c0_14] : memref<256x256xbf16, #tpu.memory_space<vmem>>, vector<256x256xbf16>
    %cst_15 = arith.constant dense<0.000000e+00> : vector<8x256xf32>
    %25 = tpu.matmul %23, %24, %cst_15 {dimension_numbers = #tpu.dot_dimension_numbers<[1], [0], [0], [1], [0, 0, 1, 1], [], []>} : vector<8x256xbf16>, vector<256x256xbf16>, vector<8x256xf32> -> vector<8x256xf32>
    %c0_16 = arith.constant 0 : index
    %c0_17 = arith.constant 0 : index
    %26 = vector.load %arg7[%c0_16, %c0_17] : memref<1x256xf32, #tpu.memory_space<vmem>>, vector<1x256xf32>
    %27 = vector.broadcast %26 : vector<1x256xf32> to vector<8x256xf32>
    %28 = arith.addf %25, %27 : vector<8x256xf32>
    %cst_18 = arith.constant 0.000000e+00 : f32
    %29 = vector.broadcast %cst_18 : f32 to vector<8x256xf32>
    %30 = arith.maximumf %28, %29 : vector<8x256xf32>
    %cst_19 = arith.constant 0.000000e+00 : f32
    %31 = vector.broadcast %cst_19 : f32 to vector<1x256xf32>
    %32 = tpu.concatenate %31, %30, %31 in 0 : vector<1x256xf32>, vector<8x256xf32>, vector<1x256xf32> -> vector<10x256xf32>
    %33 = vector.extract_strided_slice %32 {offsets = [0, 0], sizes = [8, 256], strides = [1, 1]} : vector<10x256xf32> to vector<8x256xf32>
    %34 = vector.extract_strided_slice %32 {offsets = [1, 0], sizes = [8, 256], strides = [1, 1]} : vector<10x256xf32> to vector<8x256xf32>
    %35 = vector.extract_strided_slice %32 {offsets = [2, 0], sizes = [8, 256], strides = [1, 1]} : vector<10x256xf32> to vector<8x256xf32>
    %36 = tpu.concatenate %33, %34, %35 in 1 : vector<8x256xf32>, vector<8x256xf32>, vector<8x256xf32> -> vector<8x768xf32>
    %37 = arith.truncf %36 : vector<8x768xf32> to vector<8x768xbf16>
    %c0_20 = arith.constant 0 : index
    %c0_21 = arith.constant 0 : index
    %38 = vector.load %arg8[%c0_20, %c0_21] : memref<768x128xbf16, #tpu.memory_space<vmem>>, vector<768x128xbf16>
    %cst_22 = arith.constant dense<0.000000e+00> : vector<8x128xf32>
    %39 = tpu.matmul %37, %38, %cst_22 {dimension_numbers = #tpu.dot_dimension_numbers<[1], [0], [0], [1], [0, 0, 1, 1], [], []>} : vector<8x768xbf16>, vector<768x128xbf16>, vector<8x128xf32> -> vector<8x128xf32>
    %c0_23 = arith.constant 0 : index
    %c0_24 = arith.constant 0 : index
    %40 = vector.load %arg9[%c0_23, %c0_24] : memref<1x128xf32, #tpu.memory_space<vmem>>, vector<1x128xf32>
    %41 = vector.broadcast %40 : vector<1x128xf32> to vector<8x128xf32>
    %42 = arith.addf %39, %41 : vector<8x128xf32>
    %43 = vector.extract_strided_slice %42 {offsets = [0, 0], sizes = [8, 64], strides = [1, 1]} : vector<8x128xf32> to vector<8x64xf32>
    %cst_25 = arith.constant 2.000000e+00 : f32
    %44 = vector.broadcast %cst_25 : f32 to vector<8x64xf32>
    %45 = arith.addf %43, %44 : vector<8x64xf32>
    %46 = vector.extract_strided_slice %42 {offsets = [0, 64], sizes = [8, 64], strides = [1, 1]} : vector<8x128xf32> to vector<8x64xf32>
    %cst_26 = arith.constant 0.000000e+00 : f32
    %47 = vector.broadcast %cst_26 : f32 to vector<8x64xf32>
    %48 = arith.minimumf %45, %47 : vector<8x64xf32>
    %49 = math.absf %45 : vector<8x64xf32>
    %cst_27 = arith.constant 0.000000e+00 : f32
    %50 = vector.broadcast %cst_27 : f32 to vector<8x64xf32>
    %51 = arith.subf %50, %49 : vector<8x64xf32>
    %52 = math.exp %51 : vector<8x64xf32>
    %53 = math.log1p %52 : vector<8x64xf32>
    %54 = arith.subf %48, %53 : vector<8x64xf32>
    %55 = math.exp %54 : vector<8x64xf32>
    %56 = arith.addf %8, %46 : vector<8x64xf32>
    %57 = arith.mulf %55, %56 : vector<8x64xf32>
    %cst_28 = arith.constant dense<0.000000e+00> : vector<8xf32>
    %58 = vector.multi_reduction <add>, %54, %cst_28 [1] : vector<8x64xf32> to vector<8xf32>
    %59 = vector.shape_cast %58 : vector<8xf32> to vector<8x1xf32>
    %cst_29 = arith.constant dense<0.000000e+00> : vector<1xf32>
    %60 = vector.multi_reduction <add>, %59, %cst_29 [0] : vector<8x1xf32> to vector<1xf32>
    %61 = vector.shape_cast %60 : vector<1xf32> to vector<1x1xf32>
    %cst_30 = arith.constant 1.000000e+00 : f32
    %62 = vector.broadcast %cst_30 : f32 to vector<1x128xf32>
    %63 = vector.broadcast %61 : vector<1x1xf32> to vector<1x128xf32>
    %64 = arith.mulf %63, %62 : vector<1x128xf32>
    %c0_31 = arith.constant 0 : index
    %c0_32 = arith.constant 0 : index
    %c0_33 = arith.constant 0 : index
    %65 = vector.load %arg11[%c0_31, %c0_32, %c0_33] : memref<1x1x128xf32, #tpu.memory_space<vmem>>, vector<1x1x128xf32>
    %66 = vector.shape_cast %65 : vector<1x1x128xf32> to vector<1x128xf32>
    %67 = vector.shape_cast %64 : vector<1x128xf32> to vector<1x1x128xf32>
    tpu.vector_store %arg11[%c0_31, %c0_32, %c0_33], %67 {strides = array<i32>} : memref<1x1x128xf32, #tpu.memory_space<vmem>>, vector<1x1x128xf32>,
    %68 = tpu.concatenate %7, %57 in 1 : vector<8x64xf32>, vector<8x64xf32> -> vector<8x128xf32>
    %c0_34 = arith.constant 0 : index
    %c0_35 = arith.constant 0 : index
    %c0_36 = arith.constant 0 : index
    %69 = vector.load %arg10[%c0_34, %c0_35, %c0_36] : memref<1x8x128xf32, #tpu.memory_space<vmem>>, vector<1x8x128xf32>
    %70 = vector.shape_cast %69 : vector<1x8x128xf32> to vector<8x128xf32>
    %71 = vector.shape_cast %68 : vector<8x128xf32> to vector<1x8x128xf32>
    tpu.vector_store %arg10[%c0_34, %c0_35, %c0_36], %71 {strides = array<i32>} : memref<1x8x128xf32, #tpu.memory_space<vmem>>, vector<1x8x128xf32>,
    return
  }
  func.func @transform_0(%arg0: i32) -> (i32, i32, i32) {
    %c0_i32 = arith.constant 0 : i32
    %c0_i32_0 = arith.constant 0 : i32
    %c0_i32_1 = arith.constant 0 : i32
    return %arg0, %c0_i32, %c0_i32_0 : i32, i32, i32
  }
  func.func @transform_1(%arg0: i32) -> (i32, i32) {
    %c0_i32 = arith.constant 0 : i32
    %c0_i32_0 = arith.constant 0 : i32
    %c0_i32_1 = arith.constant 0 : i32
    return %c0_i32, %c0_i32_0 : i32, i32
  }
  func.func @transform_2(%arg0: i32) -> (i32, i32) {
    %c0_i32 = arith.constant 0 : i32
    %c0_i32_0 = arith.constant 0 : i32
    %c0_i32_1 = arith.constant 0 : i32
    return %c0_i32, %c0_i32_0 : i32, i32
  }
  func.func @transform_3(%arg0: i32) -> (i32, i32) {
    %c0_i32 = arith.constant 0 : i32
    %c0_i32_0 = arith.constant 0 : i32
    %c0_i32_1 = arith.constant 0 : i32
    return %c0_i32, %c0_i32_0 : i32, i32
  }
  func.func @transform_4(%arg0: i32) -> (i32, i32) {
    %c0_i32 = arith.constant 0 : i32
    %c0_i32_0 = arith.constant 0 : i32
    %c0_i32_1 = arith.constant 0 : i32
    return %c0_i32, %c0_i32_0 : i32, i32
  }
  func.func @transform_5(%arg0: i32) -> (i32, i32) {
    %c0_i32 = arith.constant 0 : i32
    %c0_i32_0 = arith.constant 0 : i32
    %c0_i32_1 = arith.constant 0 : i32
    return %c0_i32, %c0_i32_0 : i32, i32
  }
  func.func @transform_6(%arg0: i32) -> (i32, i32) {
    %c0_i32 = arith.constant 0 : i32
    %c0_i32_0 = arith.constant 0 : i32
    %c0_i32_1 = arith.constant 0 : i32
    return %c0_i32, %c0_i32_0 : i32, i32
  }
  func.func @transform_7(%arg0: i32) -> (i32, i32) {
    %c0_i32 = arith.constant 0 : i32
    %c0_i32_0 = arith.constant 0 : i32
    %c0_i32_1 = arith.constant 0 : i32
    return %c0_i32, %c0_i32_0 : i32, i32
  }
  func.func @transform_8(%arg0: i32) -> (i32, i32) {
    %c0_i32 = arith.constant 0 : i32
    %c0_i32_0 = arith.constant 0 : i32
    %c0_i32_1 = arith.constant 0 : i32
    return %c0_i32, %c0_i32_0 : i32, i32
  }
  func.func @transform_9(%arg0: i32) -> (i32, i32, i32) {
    %c0_i32 = arith.constant 0 : i32
    %c0_i32_0 = arith.constant 0 : i32
    %c0_i32_1 = arith.constant 0 : i32
    return %arg0, %c0_i32, %c0_i32_0 : i32, i32, i32
  }
  func.func @transform_10(%arg0: i32) -> (i32, i32, i32) {
    %c0_i32 = arith.constant 0 : i32
    %c0_i32_0 = arith.constant 0 : i32
    %c0_i32_1 = arith.constant 0 : i32
    return %arg0, %c0_i32, %c0_i32_0 : i32, i32, i32
  }
}

module attributes {stable_mosaic.version = 11 : i64} {
  func.func @_flow_kernel(%arg0: i32, %arg1: memref<1x4x128xf32, #tpu.memory_space<vmem>>, %arg2: memref<128x128xf32, #tpu.memory_space<vmem>>, %arg3: memref<1x128xf32, #tpu.memory_space<vmem>>, %arg4: memref<192x128xbf16, #tpu.memory_space<vmem>>, %arg5: memref<1x128xf32, #tpu.memory_space<vmem>>, %arg6: memref<128x128xbf16, #tpu.memory_space<vmem>>, %arg7: memref<1x128xf32, #tpu.memory_space<vmem>>, %arg8: memref<384x128xbf16, #tpu.memory_space<vmem>>, %arg9: memref<1x128xf32, #tpu.memory_space<vmem>>, %arg10: memref<1x4x128xf32, #tpu.memory_space<vmem>>, %arg11: memref<1x1x128xf32, #tpu.memory_space<vmem>>) attributes {dimension_semantics = [#tpu.dimension_semantics<parallel>], iteration_bounds = array<i64: 2>, scalar_prefetch = 0 : i64, scratch_operands = 0 : i64, tpu.core_type = #tpu.core_type<tc>, window_params = [{transform_indices = @transform_0, window_bounds = array<i64: 1, 4, 128>}, {pipeline_mode = #tpu.pipeline_mode<synchronous>, transform_indices = @transform_1, window_bounds = array<i64: 128, 128>}, {pipeline_mode = #tpu.pipeline_mode<synchronous>, transform_indices = @transform_2, window_bounds = array<i64: 1, 128>}, {pipeline_mode = #tpu.pipeline_mode<synchronous>, transform_indices = @transform_3, window_bounds = array<i64: 192, 128>}, {pipeline_mode = #tpu.pipeline_mode<synchronous>, transform_indices = @transform_4, window_bounds = array<i64: 1, 128>}, {pipeline_mode = #tpu.pipeline_mode<synchronous>, transform_indices = @transform_5, window_bounds = array<i64: 128, 128>}, {pipeline_mode = #tpu.pipeline_mode<synchronous>, transform_indices = @transform_6, window_bounds = array<i64: 1, 128>}, {pipeline_mode = #tpu.pipeline_mode<synchronous>, transform_indices = @transform_7, window_bounds = array<i64: 384, 128>}, {pipeline_mode = #tpu.pipeline_mode<synchronous>, transform_indices = @transform_8, window_bounds = array<i64: 1, 128>}, {transform_indices = @transform_9, window_bounds = array<i64: 1, 4, 128>}, {transform_indices = @transform_10, window_bounds = array<i64: 1, 1, 128>}]} {
    %c0 = arith.constant 0 : index
    %c0_0 = arith.constant 0 : index
    %c0_1 = arith.constant 0 : index
    %0 = vector.load %arg1[%c0, %c0_0, %c0_1] : memref<1x4x128xf32, #tpu.memory_space<vmem>>, vector<1x4x128xf32>
    %1 = vector.shape_cast %0 : vector<1x4x128xf32> to vector<4x128xf32>
    %c0_2 = arith.constant 0 : index
    %c0_3 = arith.constant 0 : index
    %2 = vector.load %arg2[%c0_2, %c0_3] : memref<128x128xf32, #tpu.memory_space<vmem>>, vector<128x128xf32>
    %cst = arith.constant dense<0.000000e+00> : vector<4x128xf32>
    %3 = tpu.matmul %1, %2, %cst {dimension_numbers = #tpu.dot_dimension_numbers<[1], [0], [0], [1], [0, 0, 1, 1], [], []>} : vector<4x128xf32>, vector<128x128xf32>, vector<4x128xf32> -> vector<4x128xf32>
    %c0_4 = arith.constant 0 : index
    %c0_5 = arith.constant 0 : index
    %4 = vector.load %arg3[%c0_4, %c0_5] : memref<1x128xf32, #tpu.memory_space<vmem>>, vector<1x128xf32>
    %5 = vector.broadcast %4 : vector<1x128xf32> to vector<4x128xf32>
    %6 = arith.addf %3, %5 : vector<4x128xf32>
    %7 = vector.extract_strided_slice %6 {offsets = [0, 0], sizes = [4, 64], strides = [1, 1]} : vector<4x128xf32> to vector<4x64xf32>
    %8 = vector.extract_strided_slice %6 {offsets = [0, 64], sizes = [4, 64], strides = [1, 1]} : vector<4x128xf32> to vector<4x64xf32>
    %cst_6 = arith.constant 0.000000e+00 : f32
    %9 = vector.broadcast %cst_6 : f32 to vector<1x64xf32>
    %10 = tpu.concatenate %9, %7, %9 in 0 : vector<1x64xf32>, vector<4x64xf32>, vector<1x64xf32> -> vector<6x64xf32>
    %11 = vector.extract_strided_slice %10 {offsets = [0, 0], sizes = [4, 64], strides = [1, 1]} : vector<6x64xf32> to vector<4x64xf32>
    %12 = vector.extract_strided_slice %10 {offsets = [1, 0], sizes = [4, 64], strides = [1, 1]} : vector<6x64xf32> to vector<4x64xf32>
    %13 = vector.extract_strided_slice %10 {offsets = [2, 0], sizes = [4, 64], strides = [1, 1]} : vector<6x64xf32> to vector<4x64xf32>
    %14 = tpu.concatenate %11, %12, %13 in 1 : vector<4x64xf32>, vector<4x64xf32>, vector<4x64xf32> -> vector<4x192xf32>
    %15 = arith.truncf %14 : vector<4x192xf32> to vector<4x192xbf16>
    %c0_7 = arith.constant 0 : index
    %c0_8 = arith.constant 0 : index
    %16 = vector.load %arg4[%c0_7, %c0_8] : memref<192x128xbf16, #tpu.memory_space<vmem>>, vector<192x128xbf16>
    %cst_9 = arith.constant dense<0.000000e+00> : vector<4x128xf32>
    %17 = tpu.matmul %15, %16, %cst_9 {dimension_numbers = #tpu.dot_dimension_numbers<[1], [0], [0], [1], [0, 0, 1, 1], [], []>} : vector<4x192xbf16>, vector<192x128xbf16>, vector<4x128xf32> -> vector<4x128xf32>
    %c0_10 = arith.constant 0 : index
    %c0_11 = arith.constant 0 : index
    %18 = vector.load %arg5[%c0_10, %c0_11] : memref<1x128xf32, #tpu.memory_space<vmem>>, vector<1x128xf32>
    %19 = vector.broadcast %18 : vector<1x128xf32> to vector<4x128xf32>
    %20 = arith.addf %17, %19 : vector<4x128xf32>
    %cst_12 = arith.constant 0.000000e+00 : f32
    %21 = vector.broadcast %cst_12 : f32 to vector<4x128xf32>
    %22 = arith.maximumf %20, %21 : vector<4x128xf32>
    %23 = arith.truncf %22 : vector<4x128xf32> to vector<4x128xbf16>
    %c0_13 = arith.constant 0 : index
    %c0_14 = arith.constant 0 : index
    %24 = vector.load %arg6[%c0_13, %c0_14] : memref<128x128xbf16, #tpu.memory_space<vmem>>, vector<128x128xbf16>
    %cst_15 = arith.constant dense<0.000000e+00> : vector<4x128xf32>
    %25 = tpu.matmul %23, %24, %cst_15 {dimension_numbers = #tpu.dot_dimension_numbers<[1], [0], [0], [1], [0, 0, 1, 1], [], []>} : vector<4x128xbf16>, vector<128x128xbf16>, vector<4x128xf32> -> vector<4x128xf32>
    %c0_16 = arith.constant 0 : index
    %c0_17 = arith.constant 0 : index
    %26 = vector.load %arg7[%c0_16, %c0_17] : memref<1x128xf32, #tpu.memory_space<vmem>>, vector<1x128xf32>
    %27 = vector.broadcast %26 : vector<1x128xf32> to vector<4x128xf32>
    %28 = arith.addf %25, %27 : vector<4x128xf32>
    %cst_18 = arith.constant 0.000000e+00 : f32
    %29 = vector.broadcast %cst_18 : f32 to vector<4x128xf32>
    %30 = arith.maximumf %28, %29 : vector<4x128xf32>
    %cst_19 = arith.constant 0.000000e+00 : f32
    %31 = vector.broadcast %cst_19 : f32 to vector<1x128xf32>
    %32 = tpu.concatenate %31, %30, %31 in 0 : vector<1x128xf32>, vector<4x128xf32>, vector<1x128xf32> -> vector<6x128xf32>
    %33 = vector.extract_strided_slice %32 {offsets = [0, 0], sizes = [4, 128], strides = [1, 1]} : vector<6x128xf32> to vector<4x128xf32>
    %34 = vector.extract_strided_slice %32 {offsets = [1, 0], sizes = [4, 128], strides = [1, 1]} : vector<6x128xf32> to vector<4x128xf32>
    %35 = vector.extract_strided_slice %32 {offsets = [2, 0], sizes = [4, 128], strides = [1, 1]} : vector<6x128xf32> to vector<4x128xf32>
    %36 = tpu.concatenate %33, %34, %35 in 1 : vector<4x128xf32>, vector<4x128xf32>, vector<4x128xf32> -> vector<4x384xf32>
    %37 = arith.truncf %36 : vector<4x384xf32> to vector<4x384xbf16>
    %c0_20 = arith.constant 0 : index
    %c0_21 = arith.constant 0 : index
    %38 = vector.load %arg8[%c0_20, %c0_21] : memref<384x128xbf16, #tpu.memory_space<vmem>>, vector<384x128xbf16>
    %cst_22 = arith.constant dense<0.000000e+00> : vector<4x128xf32>
    %39 = tpu.matmul %37, %38, %cst_22 {dimension_numbers = #tpu.dot_dimension_numbers<[1], [0], [0], [1], [0, 0, 1, 1], [], []>} : vector<4x384xbf16>, vector<384x128xbf16>, vector<4x128xf32> -> vector<4x128xf32>
    %c0_23 = arith.constant 0 : index
    %c0_24 = arith.constant 0 : index
    %40 = vector.load %arg9[%c0_23, %c0_24] : memref<1x128xf32, #tpu.memory_space<vmem>>, vector<1x128xf32>
    %41 = vector.broadcast %40 : vector<1x128xf32> to vector<4x128xf32>
    %42 = arith.addf %39, %41 : vector<4x128xf32>
    %43 = vector.extract_strided_slice %42 {offsets = [0, 0], sizes = [4, 64], strides = [1, 1]} : vector<4x128xf32> to vector<4x64xf32>
    %cst_25 = arith.constant 2.000000e+00 : f32
    %44 = vector.broadcast %cst_25 : f32 to vector<4x64xf32>
    %45 = arith.addf %43, %44 : vector<4x64xf32>
    %46 = vector.extract_strided_slice %42 {offsets = [0, 64], sizes = [4, 64], strides = [1, 1]} : vector<4x128xf32> to vector<4x64xf32>
    %cst_26 = arith.constant 0.000000e+00 : f32
    %47 = vector.broadcast %cst_26 : f32 to vector<4x64xf32>
    %48 = arith.minimumf %45, %47 : vector<4x64xf32>
    %49 = math.absf %45 : vector<4x64xf32>
    %cst_27 = arith.constant 0.000000e+00 : f32
    %50 = vector.broadcast %cst_27 : f32 to vector<4x64xf32>
    %51 = arith.subf %50, %49 : vector<4x64xf32>
    %52 = math.exp %51 : vector<4x64xf32>
    %53 = math.log1p %52 : vector<4x64xf32>
    %54 = arith.subf %48, %53 : vector<4x64xf32>
    %55 = math.exp %54 : vector<4x64xf32>
    %56 = arith.addf %8, %46 : vector<4x64xf32>
    %57 = arith.mulf %55, %56 : vector<4x64xf32>
    %cst_28 = arith.constant dense<0.000000e+00> : vector<4xf32>
    %58 = vector.multi_reduction <add>, %54, %cst_28 [1] : vector<4x64xf32> to vector<4xf32>
    %59 = vector.shape_cast %58 : vector<4xf32> to vector<4x1xf32>
    %cst_29 = arith.constant dense<0.000000e+00> : vector<1xf32>
    %60 = vector.multi_reduction <add>, %59, %cst_29 [0] : vector<4x1xf32> to vector<1xf32>
    %61 = vector.shape_cast %60 : vector<1xf32> to vector<1x1xf32>
    %cst_30 = arith.constant 1.000000e+00 : f32
    %62 = vector.broadcast %cst_30 : f32 to vector<1x128xf32>
    %63 = vector.broadcast %61 : vector<1x1xf32> to vector<1x128xf32>
    %64 = arith.mulf %63, %62 : vector<1x128xf32>
    %c0_31 = arith.constant 0 : index
    %c0_32 = arith.constant 0 : index
    %c0_33 = arith.constant 0 : index
    %65 = vector.load %arg11[%c0_31, %c0_32, %c0_33] : memref<1x1x128xf32, #tpu.memory_space<vmem>>, vector<1x1x128xf32>
    %66 = vector.shape_cast %65 : vector<1x1x128xf32> to vector<1x128xf32>
    %67 = vector.shape_cast %64 : vector<1x128xf32> to vector<1x1x128xf32>
    tpu.vector_store %arg11[%c0_31, %c0_32, %c0_33], %67 {strides = array<i32>} : memref<1x1x128xf32, #tpu.memory_space<vmem>>, vector<1x1x128xf32>,
    %68 = tpu.concatenate %7, %57 in 1 : vector<4x64xf32>, vector<4x64xf32> -> vector<4x128xf32>
    %c0_34 = arith.constant 0 : index
    %c0_35 = arith.constant 0 : index
    %c0_36 = arith.constant 0 : index
    %69 = vector.load %arg10[%c0_34, %c0_35, %c0_36] : memref<1x4x128xf32, #tpu.memory_space<vmem>>, vector<1x4x128xf32>
    %70 = vector.shape_cast %69 : vector<1x4x128xf32> to vector<4x128xf32>
    %71 = vector.shape_cast %68 : vector<4x128xf32> to vector<1x4x128xf32>
    tpu.vector_store %arg10[%c0_34, %c0_35, %c0_36], %71 {strides = array<i32>} : memref<1x4x128xf32, #tpu.memory_space<vmem>>, vector<1x4x128xf32>,
    return
  }
  func.func @transform_0(%arg0: i32) -> (i32, i32, i32) {
    %c0_i32 = arith.constant 0 : i32
    %c0_i32_0 = arith.constant 0 : i32
    %c0_i32_1 = arith.constant 0 : i32
    return %arg0, %c0_i32, %c0_i32_0 : i32, i32, i32
  }
  func.func @transform_1(%arg0: i32) -> (i32, i32) {
    %c0_i32 = arith.constant 0 : i32
    %c0_i32_0 = arith.constant 0 : i32
    %c0_i32_1 = arith.constant 0 : i32
    return %c0_i32, %c0_i32_0 : i32, i32
  }
  func.func @transform_2(%arg0: i32) -> (i32, i32) {
    %c0_i32 = arith.constant 0 : i32
    %c0_i32_0 = arith.constant 0 : i32
    %c0_i32_1 = arith.constant 0 : i32
    return %c0_i32, %c0_i32_0 : i32, i32
  }
  func.func @transform_3(%arg0: i32) -> (i32, i32) {
    %c0_i32 = arith.constant 0 : i32
    %c0_i32_0 = arith.constant 0 : i32
    %c0_i32_1 = arith.constant 0 : i32
    return %c0_i32, %c0_i32_0 : i32, i32
  }
  func.func @transform_4(%arg0: i32) -> (i32, i32) {
    %c0_i32 = arith.constant 0 : i32
    %c0_i32_0 = arith.constant 0 : i32
    %c0_i32_1 = arith.constant 0 : i32
    return %c0_i32, %c0_i32_0 : i32, i32
  }
  func.func @transform_5(%arg0: i32) -> (i32, i32) {
    %c0_i32 = arith.constant 0 : i32
    %c0_i32_0 = arith.constant 0 : i32
    %c0_i32_1 = arith.constant 0 : i32
    return %c0_i32, %c0_i32_0 : i32, i32
  }
  func.func @transform_6(%arg0: i32) -> (i32, i32) {
    %c0_i32 = arith.constant 0 : i32
    %c0_i32_0 = arith.constant 0 : i32
    %c0_i32_1 = arith.constant 0 : i32
    return %c0_i32, %c0_i32_0 : i32, i32
  }
  func.func @transform_7(%arg0: i32) -> (i32, i32) {
    %c0_i32 = arith.constant 0 : i32
    %c0_i32_0 = arith.constant 0 : i32
    %c0_i32_1 = arith.constant 0 : i32
    return %c0_i32, %c0_i32_0 : i32, i32
  }
  func.func @transform_8(%arg0: i32) -> (i32, i32) {
    %c0_i32 = arith.constant 0 : i32
    %c0_i32_0 = arith.constant 0 : i32
    %c0_i32_1 = arith.constant 0 : i32
    return %c0_i32, %c0_i32_0 : i32, i32
  }
  func.func @transform_9(%arg0: i32) -> (i32, i32, i32) {
    %c0_i32 = arith.constant 0 : i32
    %c0_i32_0 = arith.constant 0 : i32
    %c0_i32_1 = arith.constant 0 : i32
    return %arg0, %c0_i32, %c0_i32_0 : i32, i32, i32
  }
  func.func @transform_10(%arg0: i32) -> (i32, i32, i32) {
    %c0_i32 = arith.constant 0 : i32
    %c0_i32_0 = arith.constant 0 : i32
    %c0_i32_1 = arith.constant 0 : i32
    return %arg0, %c0_i32, %c0_i32_0 : i32, i32, i32
  }
}

</mosaic_0001>

<bundles_post_ra>
// kernel: glow_forward.4
= control target key start
LH: loop header
LB: loop body
LE: loop exit
PB: predicated region body
PF: predicated region fallthrough
CT: control target
= control target key end

     0   :  { %s2084_s13 = smov 0   ;;  %s2525_s0 = inlined_call_operand.vmem [shape: f32[2,8,128], index: 0, kind: input, shape index: {}]   ;;  %s2526_s1 = inlined_call_operand.vmem [shape: f32[128,128], index: 1, kind: input, shape index: {}]   ;;  %s2527_s2 = inlined_call_operand.vmem [shape: f32[1,128], index: 2, kind: input, shape index: {}]   ;;  %s2528_s3 = inlined_call_operand.vmem [shape: bf16[192,256], index: 3, kind: input, shape index: {}]   ;;  %s2529_s4 = inlined_call_operand.vmem [shape: f32[1,256], index: 4, kind: input, shape index: {}]   ;;  %s2530_s5 = inlined_call_operand.vmem [shape: bf16[256,256], index: 5, kind: input, shape index: {}]   ;;  %s2531_s6 = inlined_call_operand.vmem [shape: f32[1,256], index: 6, kind: input, shape index: {}]   ;;  %s2532_s7 = inlined_call_operand.vmem [shape: bf16[768,128], index: 7, kind: input, shape index: {}]   ;;  %s2533_s8 = inlined_call_operand.vmem [shape: f32[1,128], index: 8, kind: input, shape index: {}]   ;;  %s2534_s9 = inlined_call_operand.vmem [shape: f32[2,8,128], index: 9, kind: output, shape index: {0}]   ;;  %s2535_s10 = inlined_call_operand.vmem [shape: f32[2,1,128], index: 10, kind: output, shape index: {1}]  }
   0x1 LB: > { %s1599_s14 = sadd.s32 4294967295, %s2023_s13   ;;  %p1603_p0 = scmp.ge.s32.totalorder %s2023_s13, 1  ;;  %s2023_s13 = sphi %s2084_s13, %s21_s13  }
   0x2   : > { %p314_p1 = scmp.lt.s32.totalorder %s2023_s13, 3 }
   0x4   : > { %p315_p2 = pnand %p1603_p0, %p314_p1 }
   0x5   : > { %v366_v0 = vld [vmem:[%s2526_s1] sm:$0xff] (!%p315_p2)  ;;  %v367_v1 = vld [vmem:[%s2526_s1 + $0x8] sm:$0xff] (!%p315_p2)  ;;  %v368_v2 = vld [vmem:[%s2526_s1 + $0x10] sm:$0xff] (!%p315_p2)  ;;  %v2025_v3 = vmov (!%p315_p2), 0.0|0.0   ;;  %vm2026_vm0 = vmmov (!%p315_p2), 0   ;;  %v2027_v6 = vmov (!%p315_p2), 0.0  }
   0x6   : > { %318 = sbr.rel (%p315_p2) target bundleno = 1307 (0x51b), region = 56  ;;  %1843 = vmatprep.subr.bf16.mxu0 (!%p315_p2), %v2025_v3  ;;  %v1844_v4 = vpack.c.bf16 (!%p315_p2), %v367_v1, %v366_v0  ;;  %v369_v5 = vld [vmem:[%s2526_s1 + $0x18] sm:$0xff] (!%p315_p2)  ;;  %1840 = vmatprep.mubr.msk.f32.mxu0 (!%p315_p2), %vm2026_vm0, %v2027_v6  ;;  %v370_v8 = vld [vmem:[%s2526_s1 + $0x20] sm:$0xff] (!%p315_p2)  ;;  %v371_v9 = vld [vmem:[%s2526_s1 + $0x28] sm:$0xff] (!%p315_p2)  ;;  %p353_p3 = scmp.lt.s32.totalorder (!%p315_p2), %s1599_s14, 1  ;;  %vm462_vm1 = vcmask (!%p315_p2), 1040384  }
   0x7   : > { %v1847_v7 = vpack.c.bf16 (!%p315_p2), %v369_v5, %v368_v2  ;;  %v372_v10 = vld [vmem:[%s2526_s1 + $0x30] sm:$0xff] (!%p315_p2)  ;;  %v1850_v11 = vpack.c.bf16 (!%p315_p2), %v371_v9, %v370_v8  ;;  %v373_v12 = vld [vmem:[%s2526_s1 + $0x38] sm:$0xff] (!%p315_p2)  ;;  %v374_v13 = vld [vmem:[%s2526_s1 + $0x40] sm:$0xff] (!%p315_p2)  ;;  %vm467_vm2 = vcmask (!%p315_p2), 1046528   ;;  %vm474_vm3 = vcmask (!%p315_p2), 1045504   ;;  %s2028_s28 = smov (!%p315_p2), 64  }
   0x8   : > { %1845 = vmatpush3.bf16.msra.mxu0 (!%p315_p2), %v1844_v4  ;;  %v375_v14 = vld [vmem:[%s2526_s1 + $0x48] sm:$0xff] (!%p315_p2)  ;;  %v1853_v15 = vpack.c.bf16 (!%p315_p2), %v373_v12, %v372_v10  ;;  %v376_v16 = vld [vmem:[%s2526_s1 + $0x50] sm:$0xff] (!%p315_p2)  ;;  %v377_v17 = vld [vmem:[%s2526_s1 + $0x58] sm:$0xff] (!%p315_p2)  ;;  %vm479_vm4 = vcmask (!%p315_p2), 523264  }
   0x9   : > { %1846 = vmatprep.subr.bf16.mxu0 (!%p315_p2), %v2025_v3  ;;  %v1856_v18 = vpack.c.bf16 (!%p315_p2), %v375_v14, %v374_v13  ;;  %v378_v19 = vld [vmem:[%s2526_s1 + $0x60] sm:$0xff] (!%p315_p2)  ;;  %v379_v20 = vld [vmem:[%s2526_s1 + $0x68] sm:$0xff] (!%p315_p2)  ;;  %v1859_v21 = vpack.c.bf16 (!%p315_p2), %v377_v17, %v376_v16  ;;  %v380_v22 = vld [vmem:[%s2526_s1 + $0x70] sm:$0xff] (!%p315_p2) }
   0xa   : > { %v381_v23 = vld [vmem:[%s2526_s1 + $0x78] sm:$0xff] (!%p315_p2)  ;;  %v1862_v24 = vpack.c.bf16 (!%p315_p2), %v379_v20, %v378_v19  ;;  %v1879_v27 = vld [vmem:[%s2528_s3 + $0x4] ss:$8 sps:$4 sm:$0xff] (!%p315_p2)   ;;  %v1881_v28 = vld [vmem:[%s2528_s3] ss:$8 sps:$4 sm:$0xff] (!%p315_p2)  }
   0xb   : > { %v1865_v25 = vpack.c.bf16 (!%p315_p2), %v381_v23, %v380_v22  ;;  %v1882_v29 = vld [vmem:[%s2528_s3 + $0x14] ss:$8 sps:$4 sm:$0xff] (!%p315_p2)   ;;  %642 = vmatprep.subr.bf16.mxu1 (!%p315_p2), %v1879_v27  ;;  %v1884_v30 = vld [vmem:[%s2528_s3 + $0x10] ss:$8 sps:$4 sm:$0xff] (!%p315_p2)   ;;  %v1885_v31 = vld [vmem:[%s2528_s3 + $0x24] ss:$8 sps:$4 sm:$0xff] (!%p315_p2)  }
   0xc   : > { %1848 = vmatpush3.bf16.msra.mxu0 (!%p315_p2), %v1847_v7  ;;  %643 = vmatpush1.bf16.msra.mxu1 (!%p315_p2), %v1881_v28  ;;  %v1887_v32 = vld [vmem:[%s2528_s3 + $0x20] ss:$8 sps:$4 sm:$0xff] (!%p315_p2)   ;;  %v1888_v33 = vld [vmem:[%s2528_s3 + $0x34] ss:$8 sps:$4 sm:$0xff] (!%p315_p2)   ;;  %v1890_v34 = vld [vmem:[%s2528_s3 + $0x30] ss:$8 sps:$4 sm:$0xff] (!%p315_p2)  }
   0xd   : > { %1849 = vmatprep.subr.bf16.mxu0 %v2025_v3  ;;  %s2539_s14 = smov (!%p353_p3, %s1599_s14), 1  ;;  %644 = vmatprep.subr.bf16.mxu1 %v1882_v29  ;;  %v1891_v35 = vld [vmem:[%s2528_s3 + $0x44] ss:$8 sps:$4 sm:$0xff]   ;;  %v1893_v36 = vld [vmem:[%s2528_s3 + $0x40] ss:$8 sps:$4 sm:$0xff]   ;;  %vm2444_vm5 = vmneg %vm462_vm1 }
   0xe   : > { %s1604_s29 = sshll.u32 %s2539_s14, 3  ;;  %v1894_v37 = vld [vmem:[%s2528_s3 + $0x54] ss:$8 sps:$4 sm:$0xff]   ;;  %v1896_v38 = vld [vmem:[%s2528_s3 + $0x50] ss:$8 sps:$4 sm:$0xff]   ;;  %vm1715_vm6 = vmpackc.low %vm2444_vm5, %vm2444_vm5  ;;  %s363_s22 = scalar_lea.vmem %s2535_s10, %s2539_s14 }
   0xf   : > { %s356_s12 = scalar_lea.vmem %s2525_s0, %s1604_s29  ;;  %v1897_v39 = vld [vmem:[%s2528_s3 + $0x64] ss:$8 sps:$4 sm:$0xff]   ;;  %v1899_v40 = vld [vmem:[%s2528_s3 + $0x60] ss:$8 sps:$4 sm:$0xff]   ;;  %v1900_v41 = vld [vmem:[%s2528_s3 + $0x74] ss:$8 sps:$4 sm:$0xff]   ;;  %s360_s25 = scalar_lea.vmem %s2534_s9, %s1604_s29 }
  0x10   : > { %1851 = vmatpush3.bf16.msra.mxu0 %v1850_v11  ;;  %v365_v26 = vld [vmem:[%s356_s12] sm:$0xff]  ;;  %645 = vmatpush1.bf16.msra.mxu1 %v1884_v30  ;;  %v1902_v42 = vld [vmem:[%s2528_s3 + $0x70] ss:$8 sps:$4 sm:$0xff]   ;;  %v1906_v45 = vld [vmem:[%s2528_s3 + $0x94] ss:$8 sps:$4 sm:$0xff]  }
  0x11   : > { %1852 = vmatprep.subr.bf16.mxu0 %v2025_v3  ;;  %646 = vmatprep.subr.bf16.mxu1 %v1885_v31  ;;  %v1903_v43 = vld [vmem:[%s2528_s3 + $0x84] ss:$8 sps:$4 sm:$0xff]   ;;  %v1905_v44 = vld [vmem:[%s2528_s3 + $0x80] ss:$8 sps:$4 sm:$0xff]   ;;  %v1908_v46 = vld [vmem:[%s2528_s3 + $0x90] ss:$8 sps:$4 sm:$0xff]  }
  0x12   : > { %v1909_v47 = vld [vmem:[%s2528_s3 + $0xa4] ss:$8 sps:$4 sm:$0xff]   ;;  %v1911_v48 = vld [vmem:[%s2528_s3 + $0xa0] ss:$8 sps:$4 sm:$0xff]   ;;  %v1912_v49 = vld [vmem:[%s2528_s3 + $0xb4] ss:$8 sps:$4 sm:$0xff]  }
  0x13   : > { %v1914_v50 = vld [vmem:[%s2528_s3 + $0xb0] ss:$8 sps:$4 sm:$0xff]   ;;  %v1606_v51 = vld [vmem:[%s2527_s2] ss:$0 sm:$0xff]  ;;  %v1917_v53 = vld [vmem:[%s2530_s5 + $0x4] ss:$8 sps:$4 sm:$0xff]  }
  0x14   : > { %1854 = vmatpush3.bf16.msra.mxu0 %v1853_v15  ;;  %647 = vmatpush1.bf16.msra.mxu1 %v1887_v32  ;;  %v1915_v52 = vld [vmem:[%s2530_s5] ss:$8 sps:$4 sm:$0xff]   ;;  %v1920_v55 = vld [vmem:[%s2530_s5 + $0x14] ss:$8 sps:$4 sm:$0xff]   ;;  %v1918_v58 = vld [vmem:[%s2530_s5 + $0x10] ss:$8 sps:$4 sm:$0xff]  }
  0x15   : > { %1855 = vmatprep.subr.bf16.mxu0 %v2025_v3  ;;  %648 = vmatprep.subr.bf16.mxu1 %v1888_v33  ;;  %v1923_v60 = vld [vmem:[%s2530_s5 + $0x24] ss:$8 sps:$4 sm:$0xff]   ;;  %v1926_v4 = vld [vmem:[%s2530_s5 + $0x34] ss:$8 sps:$4 sm:$0xff]   ;;  %v1924_v8 = vld [vmem:[%s2530_s5 + $0x30] ss:$8 sps:$4 sm:$0xff]  }
  0x16   : > { %v1929_v9 = vld [vmem:[%s2530_s5 + $0x44] ss:$8 sps:$4 sm:$0xff]   ;;  %v1927_v10 = vld [vmem:[%s2530_s5 + $0x40] ss:$8 sps:$4 sm:$0xff]   ;;  %v1932_v11 = vld [vmem:[%s2530_s5 + $0x54] ss:$8 sps:$4 sm:$0xff]  }
  0x17   : > { %v1930_v12 = vld [vmem:[%s2530_s5 + $0x50] ss:$8 sps:$4 sm:$0xff]   ;;  %v1935_v13 = vld [vmem:[%s2530_s5 + $0x64] ss:$8 sps:$4 sm:$0xff]   ;;  %v1933_v14 = vld [vmem:[%s2530_s5 + $0x60] ss:$8 sps:$4 sm:$0xff]  }
  0x18   : > { %1857 = vmatpush3.bf16.msra.mxu0 %v1856_v18  ;;  %649 = vmatpush1.bf16.msra.mxu1 %v1890_v34  ;;  %v1938_v15 = vld [vmem:[%s2530_s5 + $0x74] ss:$8 sps:$4 sm:$0xff]   ;;  %v1936_v16 = vld [vmem:[%s2530_s5 + $0x70] ss:$8 sps:$4 sm:$0xff]   ;;  %v1941_v17 = vld [vmem:[%s2530_s5 + $0x84] ss:$8 sps:$4 sm:$0xff]  }
  0x19   : > { %1858 = vmatprep.subr.bf16.mxu0 %v2025_v3  ;;  %650 = vmatprep.subr.bf16.mxu1 %v1891_v35  ;;  %v1939_v18 = vld [vmem:[%s2530_s5 + $0x80] ss:$8 sps:$4 sm:$0xff]   ;;  %v1944_v19 = vld [vmem:[%s2530_s5 + $0x94] ss:$8 sps:$4 sm:$0xff]   ;;  %v1942_v20 = vld [vmem:[%s2530_s5 + $0x90] ss:$8 sps:$4 sm:$0xff]  }
  0x1a   : > { %v1945_v22 = vld [vmem:[%s2530_s5 + $0xa0] ss:$8 sps:$4 sm:$0xff]   ;;  %v1950_v23 = vld [vmem:[%s2530_s5 + $0xb4] ss:$8 sps:$4 sm:$0xff]   ;;  %v1954_v28 = vld [vmem:[%s2530_s5 + $0xd0] ss:$8 sps:$4 sm:$0xff]  }
  0x1b   : > { %v1956_v27 = vld [vmem:[%s2530_s5 + $0xd4] ss:$8 sps:$4 sm:$0xff]   ;;  %v1959_v32 = vld [vmem:[%s2530_s5 + $0xe4] ss:$8 sps:$4 sm:$0xff]   ;;  %v1957_v33 = vld [vmem:[%s2530_s5 + $0xe0] ss:$8 sps:$4 sm:$0xff]  }
  0x1c   : > { %1860 = vmatpush3.bf16.msra.mxu0 %v1859_v21  ;;  %651 = vmatpush1.bf16.msra.mxu1 %v1893_v36  ;;  %v1947_v21 = vld [vmem:[%s2530_s5 + $0xa4] ss:$8 sps:$4 sm:$0xff]   ;;  %v1962_v34 = vld [vmem:[%s2530_s5 + $0xf4] ss:$8 sps:$4 sm:$0xff]   ;;  %v1960_v35 = vld [vmem:[%s2530_s5 + $0xf0] ss:$8 sps:$4 sm:$0xff]  }
  0x1d   : > { %1861 = vmatprep.subr.bf16.mxu0 %v2025_v3  ;;  %652 = vmatprep.subr.bf16.mxu1 %v1894_v37  ;;  %v1963_v36 = vld [vmem:[%s2532_s7 + $0x40] sm:$0xff]  }
  0x1e   : > { %v1964_v37 = vld [vmem:[%s2532_s7] sm:$0xff]  }
  0x20   : > { %1863 = vmatpush3.bf16.msra.mxu0 %v1862_v24  ;;  %653 = vmatpush1.bf16.msra.mxu1 %v1896_v38  ;;  %v1948_v24 = vld [vmem:[%s2530_s5 + $0xb0] ss:$8 sps:$4 sm:$0xff]   ;;  %v1965_v38 = vld [vmem:[%s2532_s7 + $0x48] sm:$0xff]  }
  0x21   : > { %1864 = vmatprep.subr.bf16.mxu0 %v2025_v3  ;;  %654 = vmatprep.subr.bf16.mxu1 %v1897_v39  ;;  %v1921_v3 = vld [vmem:[%s2530_s5 + $0x20] ss:$8 sps:$4 sm:$0xff]  }
  0x22   : > { %v1967_v39 = vld [vmem:[%s2532_s7 + $0x140] sm:$0xff]  }
  0x24   : > { %1866 = vmatpush3.bf16.msra.mxu0 %v1865_v25  ;;  %655 = vmatpush1.bf16.msra.mxu1 %v1899_v40  ;;  %v1953_v25 = vld [vmem:[%s2530_s5 + $0xc4] ss:$8 sps:$4 sm:$0xff]  }
  0x25   : > { %656 = vmatprep.subr.bf16.mxu1 %v1900_v41  ;;  %891 = vmatprep.subr.bf16.mxu0 %v1917_v53  ;;  %v1966_v40 = vld [vmem:[%s2532_s7 + $0x8] sm:$0xff]   ;;  %v1969_v41 = vld [vmem:[%s2532_s7 + $0x50] sm:$0xff]  }
  0x27   : > { %1841 = vmatmul.mubr.f32.vlgmr.msra.gmra.mrb[0].mxu0 %v365_v26  ;;  %v1951_v26 = vld [vmem:[%s2530_s5 + $0xc0] ss:$8 sps:$4 sm:$0xff]  }
  0x28   : > { %657 = vmatpush1.bf16.msra.mxu1 %v1902_v42  ;;  %892 = vmatpush1.bf16.msra.mxu0 %v1915_v52  ;;  %v1970_v42 = vld [vmem:[%s2532_s7 + $0x10] sm:$0xff]   ;;  %v507_v52 = vld [vmem:[%s2529_s4] sm:$0x3] }
  0x29   : > { %658 = vmatprep.subr.bf16.mxu1 %v1903_v43  ;;  %893 = vmatprep.subr.bf16.mxu0 %v1920_v55  ;;  %v1973_v43 = vld [vmem:[%s2532_s7 + $0x58] sm:$0xff]  }
  0x2c   : > { %659 = vmatpush1.bf16.msra.mxu1 %v1905_v44  ;;  %894 = vmatpush1.bf16.msra.mxu0 %v1918_v58  ;;  %v1974_v44 = vld [vmem:[%s2532_s7 + $0x18] sm:$0xff]  }
  0x2d   : > { %660 = vmatprep.subr.bf16.mxu1 %v1906_v45  ;;  %895 = vmatprep.subr.bf16.mxu0 %v1923_v60  ;;  %v1977_v45 = vld [vmem:[%s2532_s7 + $0x60] sm:$0xff]  }
  0x30   : > { %661 = vmatpush1.bf16.msra.mxu1 %v1908_v46  ;;  %896 = vmatpush1.bf16.msra.mxu0 %v1921_v3  ;;  %v1978_v46 = vld [vmem:[%s2532_s7 + $0x20] sm:$0xff]  }
  0x31   : > { %662 = vmatprep.subr.bf16.mxu1 %v1909_v47  ;;  %897 = vmatprep.subr.bf16.mxu0 %v1926_v4  ;;  %v1981_v47 = vld [vmem:[%s2532_s7 + $0x68] sm:$0xff]  }
  0x32   : > { %v1971_v4 = vld [vmem:[%s2532_s7 + $0x148] sm:$0xff]  }
  0x34   : > { %663 = vmatpush1.bf16.msra.mxu1 %v1911_v48  ;;  %898 = vmatpush1.bf16.msra.mxu0 %v1924_v8  ;;  %v1982_v48 = vld [vmem:[%s2532_s7 + $0x28] sm:$0xff]   ;;  %v1979_v8 = vld [vmem:[%s2532_s7 + $0x158] sm:$0xff]  }
  0x35   : > { %664 = vmatprep.subr.bf16.mxu1 %v1912_v49  ;;  %899 = vmatprep.subr.bf16.mxu0 %v1929_v9  ;;  %v509_v49 = vlaneseq  ;;  %v1980_v9 = vld [vmem:[%s2532_s7 + $0x118] sm:$0xff]  }
  0x38   : > { %665 = vmatpush1.bf16.msra.mxu1 %v1914_v50  ;;  %900 = vmatpush1.bf16.msra.mxu0 %v1927_v10  ;;  %v510_v50 = vshrl.u32 %v509_v49, 7  ;;  %v1983_v10 = vld [vmem:[%s2532_s7 + $0x160] sm:$0xff]  }
  0x39   : > { %901 = vmatprep.subr.bf16.mxu0 %v1932_v11  ;;  %1742 = vmatprep.subr.bf16.mxu1 %v1963_v36  ;;  %v1984_v11 = vld [vmem:[%s2532_s7 + $0x120] sm:$0xff]  }
  0x3a   : > { %v515_v53 = vsub.s32 1, %v510_v50 }
  0x3c   : > { %902 = vmatpush1.bf16.msra.mxu0 %v1930_v12  ;;  %v516_v55 = vrot.slane %v507_v52, %v515_v53  ;;  %v1985_v12 = vld [vmem:[%s2532_s7 + $0x70] sm:$0xff]  }
  0x3d   : > { %903 = vmatprep.subr.bf16.mxu0 %v1935_v13  ;;  %v1986_v13 = vld [vmem:[%s2532_s7 + $0x30] sm:$0xff]  }
  0x40   : > { %904 = vmatpush1.bf16.msra.mxu0 %v1933_v14  ;;  %v1987_v14 = vld [vmem:[%s2532_s7 + $0x168] sm:$0xff]  }
  0x41   : > { %905 = vmatprep.subr.bf16.mxu0 %v1938_v15  ;;  %v1988_v15 = vld [vmem:[%s2532_s7 + $0x128] sm:$0xff]  }
  0x44   : > { %906 = vmatpush1.bf16.msra.mxu0 %v1936_v16  ;;  %v1989_v16 = vld [vmem:[%s2532_s7 + $0x78] sm:$0xff]  }
  0x45   : > { %907 = vmatprep.subr.bf16.mxu0 %v1941_v17  ;;  %v1990_v17 = vld [vmem:[%s2532_s7 + $0x38] sm:$0xff]  }
  0x48   : > { %908 = vmatpush1.bf16.msra.mxu0 %v1939_v18  ;;  %v1991_v18 = vld [vmem:[%s2532_s7 + $0x170] sm:$0xff]  }
  0x49   : > { %909 = vmatprep.subr.bf16.mxu0 %v1944_v19  ;;  %v1992_v19 = vld [vmem:[%s2532_s7 + $0x130] sm:$0xff]  }
  0x4c   : > { %910 = vmatpush1.bf16.msra.mxu0 %v1942_v20  ;;  %v1993_v20 = vld [vmem:[%s2532_s7 + $0xc0] sm:$0xff]  }
  0x4d   : > { %911 = vmatprep.subr.bf16.mxu0 %v1947_v21  ;;  %v1995_v21 = vld [vmem:[%s2532_s7 + $0x178] sm:$0xff]  }
  0x50   : > { %912 = vmatpush1.bf16.msra.mxu0 %v1945_v22  ;;  %v1996_v22 = vld [vmem:[%s2532_s7 + $0x138] sm:$0xff]  }
  0x51   : > { %913 = vmatprep.subr.bf16.mxu0 %v1950_v23  ;;  %v719_v23 = vld [vmem:[%s2531_s6] sm:$0x3] }
  0x54   : > { %914 = vmatpush1.bf16.msra.mxu0 %v1948_v24 }
  0x55   : > { %915 = vmatprep.subr.bf16.mxu0 %v1953_v25  ;;  %v728_v25 = vrot.slane %v719_v23, %v515_v53 }
  0x58   : > { %916 = vmatpush1.bf16.msra.mxu0 %v1951_v26 }
  0x59   : > { %917 = vmatprep.subr.bf16.mxu0 %v1956_v27 }
  0x5c   : > { %918 = vmatpush1.bf16.msra.mxu0 %v1954_v28 }
  0x5d   : > { %919 = vmatprep.subr.bf16.mxu0 %v1959_v32 }
  0x60   : > { %920 = vmatpush1.bf16.msra.mxu0 %v1957_v33 }
  0x61   : > { %921 = vmatprep.subr.bf16.mxu0 %v1962_v34 }
  0x64   : > { %922 = vmatpush1.bf16.msra.mxu0 %v1960_v35 }
  0x65   : > { %1786 = vmatprep.subr.bf16.mxu0 %v1967_v39 }
  0xfa   : > { %v455_v54 = vpop.f32.mrb[0].mxu0 }
  0xfb   : > { %v2236_v56 = vadd.f32 %v1606_v51, %v455_v54  ;;  %v1842_v57 = vpop.f32.mrb[1].mxu0  ;;  %v511_v51 = vsub.s32 0, %v510_v50  ;;  %v1997_v50 = vld [vmem:[%s2532_s7 + $0xc8] sm:$0xff]  }
  0xfd   : > { %v460_v59 = vrot.slane %v2236_v56, 7  ;;  %v512_v54 = vrot.slane %v507_v52, %v511_v51  ;;  %v724_v24 = vrot.slane %v719_v23, %v511_v51 }
  0xff   : > { %v2246_v61 = vsel %vm462_vm1, 0.0, %v460_v59  ;;  %v464_v62 = vsel %vm462_vm1, %v460_v59, 0.0 }
 0x100   : > { %v468_v63 = vrot.slane %v2246_v61, 1  ;;  %v469_v0 = vrot.slane %v464_v62, 1  ;;  %v475_v1 = vrot.slane %v2246_v61, 2  ;;  %v476_v2 = vrot.slane %v464_v62, 2 }
 0x102   : > { %v470_v5 = vsel %vm467_vm2, %v468_v63, %v469_v0  ;;  %v477_v6 = vsel %vm474_vm3, %v475_v1, %v476_v2  ;;  %v1968_v2 = vld [vmem:[%s2532_s7 + $0x100] sm:$0xff]  }
 0x103   : > { %471 = vrot.lane.b32.xlu0 %v470_v5, %s2028_s28  ;;  %v482_v7 = vpack.c.bf16 %v477_v6, %v477_v6  ;;  %v1972_v5 = vld [vmem:[%s2532_s7 + $0x108] sm:$0xff]   ;;  %v1975_v6 = vld [vmem:[%s2532_s7 + $0x150] sm:$0xff]  }
 0x105   : > { %1631 = vmatprep.mubr.msk.bf16.mxu1 %vm479_vm4, %v482_v7  ;;  %v1976_v7 = vld [vmem:[%s2532_s7 + $0x110] sm:$0xff]  }
 0x175   : > { %v472_v29 = vpop.permute.xlu0 %471 }
 0x176   : > { %v480_v30 = vsel %vm479_vm4, %v2246_v61, %v472_v29 }
 0x177   : > { %v481_v31 = vpack.c.bf16 %v480_v30, %v480_v30 }
 0x179   : > { %675 = vmatmul.mubr.bf16.vlgmr.msra.gmra.mrb[0].mxu1 %v481_v31 }
 0x17a   : > { %1743 = vmatpush3.bf16.msra.mxu1 %v1964_v37 }
 0x17b   : > { %1744 = vmatprep.subr.bf16.mxu1 %v1965_v38 }
 0x17e   : > { %1745 = vmatpush3.bf16.msra.mxu1 %v1966_v40 }
 0x17f   : > { %1746 = vmatprep.subr.bf16.mxu1 %v1969_v41 }
 0x182   : > { %1747 = vmatpush3.bf16.msra.mxu1 %v1970_v42 }
 0x183   : > { %1748 = vmatprep.subr.bf16.mxu1 %v1973_v43 }
 0x186   : > { %1749 = vmatpush3.bf16.msra.mxu1 %v1974_v44 }
 0x187   : > { %1750 = vmatprep.subr.bf16.mxu1 %v1977_v45  ;;  %v1994_v45 = vld [vmem:[%s2532_s7 + $0x80] sm:$0xff]  }
 0x18a   : > { %1751 = vmatpush3.bf16.msra.mxu1 %v1978_v46 }
 0x18b   : > { %1752 = vmatprep.subr.bf16.mxu1 %v1981_v47 }
 0x18e   : > { %1753 = vmatpush3.bf16.msra.mxu1 %v1982_v48 }
 0x18f   : > { %1754 = vmatprep.subr.bf16.mxu1 %v1985_v12 }
 0x192   : > { %1755 = vmatpush3.bf16.msra.mxu1 %v1986_v13 }
 0x193   : > { %1756 = vmatprep.subr.bf16.mxu1 %v1989_v16 }
 0x196   : > { %1757 = vmatpush3.bf16.msra.mxu1 %v1990_v17 }
 0x197   : > { %1764 = vmatprep.subr.bf16.mxu1 %v1993_v20 }
 0x24c   : > { %v676_v57 = vpop.f32.mrb[0].mxu1 }
 0x24d   : > { %v677_v58 = vadd.f32 %v676_v57, %v512_v54  ;;  %v678_v59 = vpop.f32.mrb[1].mxu1  ;;  %v1998_v57 = vld [vmem:[%s2532_s7 + $0x88] sm:$0xff]  }
 0x24e   : > { %v679_v60 = vadd.f32 %v678_v59, %v516_v55  ;;  %v680_v61 = vpop.f32.mrb[2].mxu1  ;;  %v1999_v59 = vld [vmem:[%s2532_s7 + $0xd0] sm:$0xff]  }
 0x24f   : > { %v683_v62 = vmax.f32 %v677_v58, 0.0  ;;  %v681_v63 = vpop.f32.mrb[3].mxu1  ;;  %v2001_v61 = vld [vmem:[%s2532_s7 + $0xd8] sm:$0xff]  }
 0x250   : > { %v684_v0 = vmax.f32 %v679_v60, 0.0  ;;  %v2000_v60 = vld [vmem:[%s2532_s7 + $0x90] sm:$0xff]   ;;  %v2003_v63 = vld [vmem:[%s2532_s7 + $0xe0] sm:$0xff]  }
 0x251   : > { %v685_v3 = vpack.c.bf16 %v683_v62, %v683_v62  ;;  %v2002_v62 = vld [vmem:[%s2532_s7 + $0x98] sm:$0xff]  }
 0x252   : > { %v686_v1 = vpack.c.bf16 %v684_v0, %v684_v0  ;;  %v2004_v0 = vld [vmem:[%s2532_s7 + $0xa0] sm:$0xff]  }
 0x254   : > { %923 = vmatprep.mubr.bf16.mxu0 %v686_v1  ;;  %v2005_v1 = vld [vmem:[%s2532_s7 + $0xe8] sm:$0xff]  }
 0x255   : > { %924 = vmatmul.mubr.bf16.vlgmr.msra.gmra.mrb[4].mxu0 %v685_v3  ;;  %v2007_v3 = vld [vmem:[%s2532_s7 + $0xf0] sm:$0xff]  }
 0x256   : > { %1787 = vmatpush3.bf16.msra.mxu0 %v1968_v2  ;;  %v2006_v2 = vld [vmem:[%s2532_s7 + $0xa8] sm:$0xff]  }
 0x257   : > { %1788 = vmatprep.subr.bf16.mxu0 %v1971_v4  ;;  %v2008_v4 = vld [vmem:[%s2532_s7 + $0xb0] sm:$0xff]  }
 0x25a   : > { %1789 = vmatpush3.bf16.msra.mxu0 %v1972_v5  ;;  %v2009_v5 = vld [vmem:[%s2532_s7 + $0xf8] sm:$0xff]  }
 0x25b   : > { %1790 = vmatprep.subr.bf16.mxu0 %v1975_v6 }
 0x25e   : > { %1791 = vmatpush3.bf16.msra.mxu0 %v1976_v7 }
 0x25f   : > { %1792 = vmatprep.subr.bf16.mxu0 %v1979_v8  ;;  %v2010_v8 = vld [vmem:[%s2532_s7 + $0xb8] sm:$0xff]  }
 0x262   : > { %1793 = vmatpush3.bf16.msra.mxu0 %v1980_v9 }
 0x263   : > { %1794 = vmatprep.subr.bf16.mxu0 %v1983_v10 }
 0x266   : > { %1795 = vmatpush3.bf16.msra.mxu0 %v1984_v11 }
 0x267   : > { %1796 = vmatprep.subr.bf16.mxu0 %v1987_v14 }
 0x26a   : > { %1797 = vmatpush3.bf16.msra.mxu0 %v1988_v15 }
 0x26b   : > { %1798 = vmatprep.subr.bf16.mxu0 %v1991_v18 }
 0x26e   : > { %1799 = vmatpush3.bf16.msra.mxu0 %v1992_v19 }
 0x26f   : > { %1800 = vmatprep.subr.bf16.mxu0 %v1995_v21  ;;  %v1664_v21 = vld [vmem:[%s2533_s8] ss:$0 sm:$0xff] }
 0x272   : > { %1801 = vmatpush3.bf16.msra.mxu0 %v1996_v22 }
 0x328   : > { %v925_v26 = vpop.f32.mrb[4].mxu0 }
 0x329   : > { %v926_v27 = vadd.f32 %v925_v26, %v724_v24  ;;  %v927_v28 = vpop.f32.mrb[5].mxu0 }
 0x32a   : > { %v928_v29 = vadd.f32 %v927_v28, %v728_v25  ;;  %v929_v30 = vpop.f32.mrb[6].mxu0 }
 0x32b   : > { %v932_v31 = vmax.f32 %v926_v27, 0.0  ;;  %v930_v32 = vpop.f32.mrb[7].mxu0 }
 0x32c   : > { %v933_v33 = vmax.f32 %v928_v29, 0.0 }
 0x32d   : > { %v936_v34 = vrot.slane %v932_v31, 7 }
 0x32e   : > { %v937_v36 = vrot.slane %v933_v33, 7 }
 0x32f   : > { %v940_v37 = vsel %vm462_vm1, 0.0, %v936_v34  ;;  %v942_v38 = vsel %vm462_vm1, %v936_v34, 0.0  ;;  %v1721_v41 = vpack.c.bf16 %v936_v34, %v936_v34 }
 0x330   : > { %v956_v39 = vrot.slane %v940_v37, 2  ;;  %v957_v40 = vrot.slane %v942_v38, 2  ;;  %v941_v42 = vsel %vm462_vm1, 0.0, %v937_v36  ;;  %v943_v43 = vsel %vm462_vm1, %v937_v36, 0.0 }
 0x331   : > { %v1716_v44 = vpack.c.bf16 %v937_v36, %v937_v36  ;;  %v951_v46 = vrot.slane %v941_v42, 1  ;;  %v952_v47 = vrot.slane %v943_v43, 1  ;;  %v959_v48 = vrot.slane %v941_v42, 2 }
 0x332   : > { %v960_v49 = vrot.slane %v943_v43, 2  ;;  %v958_v51 = vsel %vm474_vm3, %v956_v39, %v957_v40  ;;  %v948_v6 = vrot.slane %v940_v37, 1  ;;  %v949_v7 = vrot.slane %v942_v38, 1 }
 0x333   : > { %1717 = vmatprep.mubr.msk.bf16.mxu1 %vm1715_vm6, %v1716_v44  ;;  %v953_v52 = vsel %vm467_vm2, %v951_v46, %v952_v47  ;;  %v968_v58 = vpack.c.bf16 %v958_v51, %v958_v51 }
 0x334   : > { %1722 = vmatmul.mubr.msk.bf16.vlgmr.msra.gmra.mrb[4].mxu1 %vm1715_vm6, %v1721_v41  ;;  %v961_v53 = vsel %vm474_vm3, %v959_v48, %v960_v49  ;;  %v967_v54 = vpack.c.bf16 %v953_v52, %v953_v52  ;;  %v950_v9 = vsel %vm467_vm2, %v948_v6, %v949_v7 }
 0x335   : > { %1765 = vmatpush3.bf16.msra.mxu1 %v1994_v45  ;;  %v969_v55 = vpack.c.bf16 %v961_v53, %v961_v53  ;;  %v966_v10 = vpack.c.bf16 %v950_v9, %v950_v9 }
 0x336   : > { %1766 = vmatprep.subr.bf16.mxu1 %v1997_v50  ;;  %1433 = vmatprep.mubr.bf16.mxu1 %v967_v54 }
 0x337   : > { %1473 = vmatprep.mubr.bf16.mxu0 %v969_v55 }
 0x338   : > { %1474 = vmatmul.mubr.bf16.vlgmr.msra.gmra.mrb[8].mxu0 %v968_v58 }
 0x339   : > { %1767 = vmatpush3.bf16.msra.mxu1 %v1998_v57 }
 0x33a   : > { %1768 = vmatprep.subr.bf16.mxu1 %v1999_v59 }
 0x33d   : > { %1769 = vmatpush3.bf16.msra.mxu1 %v2000_v60 }
 0x33e   : > { %1770 = vmatprep.subr.bf16.mxu1 %v2001_v61 }
 0x341   : > { %1771 = vmatpush3.bf16.msra.mxu1 %v2002_v62 }
 0x342   : > { %1772 = vmatprep.subr.bf16.mxu1 %v2003_v63 }
 0x345   : > { %1773 = vmatpush3.bf16.msra.mxu1 %v2004_v0 }
 0x346   : > { %1774 = vmatprep.subr.bf16.mxu1 %v2005_v1 }
 0x349   : > { %1775 = vmatpush3.bf16.msra.mxu1 %v2006_v2 }
 0x34a   : > { %1776 = vmatprep.subr.bf16.mxu1 %v2007_v3 }
 0x34d   : > { %1777 = vmatpush3.bf16.msra.mxu1 %v2008_v4 }
 0x34e   : > { %1778 = vmatprep.subr.bf16.mxu1 %v2009_v5 }
 0x351   : > { %1779 = vmatpush3.bf16.msra.mxu1 %v2010_v8 }
 0x354   : > { %1434 = vmatmul.mubr.bf16.vlgmr.msra.gmra.mrb[8].mxu1 %v966_v10 }
 0x407   : > { %v1758_v11 = vpop.f32.mrb[4].mxu1 }
 0x408   : > { %v1759_v12 = vpop.f32.mrb[5].mxu1 }
 0x409   : > { %v1760_v13 = vadd.f32 %v1759_v12, %v1758_v11  ;;  %v1761_v14 = vpop.f32.mrb[6].mxu1 }
 0x40a   : > { %v1762_v15 = vpop.f32.mrb[7].mxu1 }
 0x40b   : > { %v1802_v16 = vpop.f32.mrb[8].mxu0  ;;  %v1396_v24 = vadd.f32 %v1760_v13, %v1664_v21 }
 0x40c   : > { %v1803_v17 = vpop.f32.mrb[9].mxu0 }
 0x40d   : > { %v1804_v18 = vadd.f32 %v1803_v17, %v1802_v16  ;;  %v1805_v19 = vpop.f32.mrb[10].mxu0 }
 0x40e   : > { %v1806_v20 = vpop.f32.mrb[11].mxu0 }
 0x427   : > { %v1780_v22 = vpop.f32.mrb[8].mxu1 }
 0x428   : > { %v1781_v23 = vpop.f32.mrb[9].mxu1 }
 0x429   : > { %v1782_v25 = vadd.f32 %v1781_v23, %v1780_v22  ;;  %v1783_v26 = vpop.f32.mrb[10].mxu1 }
 0x42a   : > { %v1784_v27 = vpop.f32.mrb[11].mxu1 }
 0x42b   : > { %v1436_v28 = vadd.f32 %v1782_v25, %v1396_v24 }
 0x42d   : > { %v1476_v29 = vadd.f32 %v1804_v18, %v1436_v28 }
 0x42f   : > { %v1499_v30 = vadd.f32 %v1476_v29, %v2236_v56  ;;  %v1481_v31 = vadd.f32 2.0, %v1476_v29 }
 0x431   : > { %1501 = vrot.lane.b32.xlu0 %v1499_v30, %s2028_s28  ;;  %v1483_v32 = vand.u32 2147483647, %v1481_v31  ;;  %v1482_v43 = vmin.f32 %v1481_v31, 0.0 }
 0x433   : > { %v1484_v33 = vsub.f32 0.0, %v1483_v32 }
 0x435   : > { %v1485_v34 = vmul.f32 1.442695, %v1484_v33 }
 0x437   : > { %2011 = vpow2.f32 %v1485_v34 }
 0x441   : > { %v2012_v35 = vpop.eup %2011 }
 0x442   : > { %v1487_v36 = vadd.f32 1.0, %v2012_v35  ;;  %v1490_v37 = vmul.f32 -0.5, %v2012_v35  ;;  %v1493_v39 = vand.u32 2147483647, %v2012_v35 }
 0x444   : > { %2013 = vlog2.f32 %v1487_v36  ;;  %v1491_v38 = vadd.f32 1.0, %v1490_v37  ;;  %vm1494_vm7 = vcmp.lt.f32.partialorder %v1493_v39, 0.0004427343 }
 0x446   : > { %v1492_v42 = vmul.f32 %v2012_v35, %v1491_v38 }
 0x44e   : > { %v2014_v40 = vpop.eup %2013 }
 0x44f   : > { %v1489_v41 = vmul.f32 0.6931472, %v2014_v40 }
 0x451   : > { %v1495_v44 = vsel %vm1494_vm7, %v1492_v42, %v1489_v41 }
 0x452   : > { %v1496_v45 = vsub.f32 %v1482_v43, %v1495_v44 }
 0x454   : > { %v1505_v46 = vsel %vm479_vm4, %v1496_v45, 0.0  ;;  %v1497_v47 = vmul.f32 1.442695, %v1496_v45 }
 0x455   : > { %1506 = vadd.xlane.f32.xlu1 %v1505_v46 }
 0x456   : > { %2015 = vpow2.f32 %v1497_v47 }
 0x460   : > { %v2016_v48 = vpop.eup %2015 }
 0x4a3   : > { %v1502_v49 = vpop.permute.xlu0 %1501 }
 0x4a4   : > { %v1504_v50 = vmul.f32 %v2016_v48, %v1502_v49 }
 0x4a6   : > { %1516 = vrot.lane.b32.xlu1 %v1504_v50, %s2028_s28 }
 0x4e2   : > { %v1507_v51 = vpop.xlane.xlu1 %1506 }
 0x4e3   : > { %v1508_v52 = vrot.slane %v1507_v51, 4 }
 0x4e5   : > { %v1509_v53 = vadd.f32 %v1508_v52, %v1507_v51 }
 0x4e7   : > { %v1510_v54 = vrot.slane %v1509_v53, 2 }
 0x4e9   : > { %v1511_v55 = vadd.f32 %v1510_v54, %v1509_v53 }
 0x4eb   : > { %v1512_v57 = vrot.slane %v1511_v55, 1 }
 0x4ed   : > { %v1513_v58 = vadd.f32 %v1512_v57, %v1511_v55 }
 0x4ef   : > { %1514 = vst [vmem:[%s363_s22] sm:$0x1] %v1513_v58 }
 0x518   : > { %v1517_v59 = vpop.permute.xlu1 %1516 }
 0x519   : > { %v1519_v60 = vsel %vm479_vm4, %v2236_v56, %v1517_v59 }
 0x51a   : > { %1520 = vst [vmem:[%s360_s25] sm:$0xff] %v1519_v60 }
 0x51b PF: > { %s21_s13 = sadd.s32 1, %s2023_s13  }
 0x51c   : > { %p18_p4 = scmp.ge.s32.totalorder %s21_s13, 4  }
 0x51e   :  { %20 = sbr.rel (!%p18_p4) target bundleno = 1 (0x1), region = 98 }

// kernel: glow_forward.6
= control target key start
LH: loop header
LB: loop body
LE: loop exit
PB: predicated region body
PF: predicated region fallthrough
CT: control target
= control target key end

     0   :  { %s1498_s13 = smov 0   ;;  %s1757_s0 = inlined_call_operand.vmem [shape: f32[2,4,128], index: 0, kind: input, shape index: {}]   ;;  %s1758_s1 = inlined_call_operand.vmem [shape: f32[128,128], index: 1, kind: input, shape index: {}]   ;;  %s1759_s2 = inlined_call_operand.vmem [shape: f32[1,128], index: 2, kind: input, shape index: {}]   ;;  %s1760_s3 = inlined_call_operand.vmem [shape: bf16[192,128], index: 3, kind: input, shape index: {}]   ;;  %s1761_s4 = inlined_call_operand.vmem [shape: f32[1,128], index: 4, kind: input, shape index: {}]   ;;  %s1762_s5 = inlined_call_operand.vmem [shape: bf16[128,128], index: 5, kind: input, shape index: {}]   ;;  %s1763_s6 = inlined_call_operand.vmem [shape: f32[1,128], index: 6, kind: input, shape index: {}]   ;;  %s1764_s7 = inlined_call_operand.vmem [shape: bf16[384,128], index: 7, kind: input, shape index: {}]   ;;  %s1765_s8 = inlined_call_operand.vmem [shape: f32[1,128], index: 8, kind: input, shape index: {}]   ;;  %s1766_s9 = inlined_call_operand.vmem [shape: f32[2,4,128], index: 9, kind: output, shape index: {0}]   ;;  %s1767_s10 = inlined_call_operand.vmem [shape: f32[2,1,128], index: 10, kind: output, shape index: {1}]  }
   0x1 LB: > { %s1150_s14 = sadd.s32 4294967295, %s1436_s13   ;;  %p1154_p0 = scmp.ge.s32.totalorder %s1436_s13, 1  ;;  %s1436_s13 = sphi %s1498_s13, %s21_s13  }
   0x2   : > { %p314_p1 = scmp.lt.s32.totalorder %s1436_s13, 3 }
   0x4   : > { %p315_p2 = pnand %p1154_p0, %p314_p1 }
   0x5   : > { %v366_v0 = vld [vmem:[%s1758_s1] sm:$0xff] (!%p315_p2)  ;;  %v367_v1 = vld [vmem:[%s1758_s1 + $0x8] sm:$0xff] (!%p315_p2)  ;;  %v368_v2 = vld [vmem:[%s1758_s1 + $0x10] sm:$0xff] (!%p315_p2)  ;;  %v1438_v3 = vmov (!%p315_p2), 0.0|0.0   ;;  %vm1439_vm0 = vmmov (!%p315_p2), 0   ;;  %v1440_v6 = vmov (!%p315_p2), 0.0  }
   0x6   : > { %318 = sbr.rel (%p315_p2) target bundleno = 1275 (0x4fb), region = 56  ;;  %1343 = vmatprep.subr.bf16.mxu0 (!%p315_p2), %v1438_v3  ;;  %v1344_v4 = vpack.c.bf16 (!%p315_p2), %v367_v1, %v366_v0  ;;  %v369_v5 = vld [vmem:[%s1758_s1 + $0x18] sm:$0xff] (!%p315_p2)  ;;  %1300 = vmatprep.mubr.msk.f32.mxu0 (!%p315_p2), %vm1439_vm0, %v1440_v6  ;;  %p353_p3 = scmp.lt.s32.totalorder (!%p315_p2), %s1150_s14, 1  ;;  %v370_v8 = vld [vmem:[%s1758_s1 + $0x20] sm:$0xff] (!%p315_p2)  ;;  %v371_v9 = vld [vmem:[%s1758_s1 + $0x28] sm:$0xff] (!%p315_p2)  ;;  %v1441_v28 = vmov (!%p315_p2), 0  }
   0x7   : > { %v1347_v7 = vpack.c.bf16 (!%p315_p2), %v369_v5, %v368_v2  ;;  %v372_v10 = vld [vmem:[%s1758_s1 + $0x30] sm:$0xff] (!%p315_p2)  ;;  %v1350_v11 = vpack.c.bf16 (!%p315_p2), %v371_v9, %v370_v8  ;;  %v373_v12 = vld [vmem:[%s1758_s1 + $0x38] sm:$0xff] (!%p315_p2)  ;;  %v374_v13 = vld [vmem:[%s1758_s1 + $0x40] sm:$0xff] (!%p315_p2)  ;;  %583 = vmatprep.subr.bf16.mxu1 (!%p315_p2), %v1441_v28  ;;  %vm462_vm1 = vcmask (!%p315_p2), 1040384   ;;  %vm464_vm2 = vcmask (!%p315_p2), 1044480   ;;  %s1442_s12 = smov (!%p315_p2), 64  }
   0x8   : > { %1345 = vmatpush3.bf16.msra.mxu0 (!%p315_p2), %v1344_v4  ;;  %v375_v14 = vld [vmem:[%s1758_s1 + $0x48] sm:$0xff] (!%p315_p2)  ;;  %v1353_v15 = vpack.c.bf16 (!%p315_p2), %v373_v12, %v372_v10  ;;  %v376_v16 = vld [vmem:[%s1758_s1 + $0x50] sm:$0xff] (!%p315_p2)  ;;  %v377_v17 = vld [vmem:[%s1758_s1 + $0x58] sm:$0xff] (!%p315_p2)  ;;  %vm473_vm3 = vcmask (!%p315_p2), 523264   ;;  %vm1053_vm6 = vcmask (!%p315_p2), 519168   ;;  %vm1057_vm7 = vcmask (!%p315_p2), 1043456  }
   0x9   : > { %1346 = vmatprep.subr.bf16.mxu0 (!%p315_p2), %v1438_v3  ;;  %v1356_v18 = vpack.c.bf16 (!%p315_p2), %v375_v14, %v374_v13  ;;  %v378_v19 = vld [vmem:[%s1758_s1 + $0x60] sm:$0xff] (!%p315_p2)  ;;  %v379_v20 = vld [vmem:[%s1758_s1 + $0x68] sm:$0xff] (!%p315_p2)  ;;  %v1359_v21 = vpack.c.bf16 (!%p315_p2), %v377_v17, %v376_v16  ;;  %v380_v22 = vld [vmem:[%s1758_s1 + $0x70] sm:$0xff] (!%p315_p2) }
   0xa   : > { %v381_v23 = vld [vmem:[%s1758_s1 + $0x78] sm:$0xff] (!%p315_p2)  ;;  %v1362_v24 = vpack.c.bf16 (!%p315_p2), %v379_v20, %v378_v19  ;;  %v1380_v27 = vld [vmem:[%s1760_s3] sm:$0xff] (!%p315_p2)   ;;  %v1381_v29 = vld [vmem:[%s1760_s3 + $0x8] sm:$0xff] (!%p315_p2)  }
   0xb   : > { %v1365_v25 = vpack.c.bf16 (!%p315_p2), %v381_v23, %v380_v22  ;;  %584 = vmatpush1.bf16.msra.mxu1 (!%p315_p2), %v1380_v27  ;;  %v1382_v30 = vld [vmem:[%s1760_s3 + $0x10] sm:$0xff] (!%p315_p2)   ;;  %v1383_v31 = vld [vmem:[%s1760_s3 + $0x18] sm:$0xff] (!%p315_p2)   ;;  %v1384_v32 = vld [vmem:[%s1760_s3 + $0x20] sm:$0xff] (!%p315_p2)  }
   0xc   : > { %1348 = vmatpush3.bf16.msra.mxu0 (!%p315_p2), %v1347_v7  ;;  %585 = vmatprep.subr.bf16.mxu1 (!%p315_p2), %v1441_v28  ;;  %v1385_v33 = vld [vmem:[%s1760_s3 + $0x28] sm:$0xff] (!%p315_p2)   ;;  %v1386_v34 = vld [vmem:[%s1760_s3 + $0x30] sm:$0xff] (!%p315_p2)   ;;  %v1387_v35 = vld [vmem:[%s1760_s3 + $0x38] sm:$0xff] (!%p315_p2)  }
   0xd   : > { %s1769_s14 = smov (!%p353_p3, %s1150_s14), 1  ;;  %1349 = vmatprep.subr.bf16.mxu0 %v1438_v3  ;;  %v1388_v36 = vld [vmem:[%s1760_s3 + $0x40] sm:$0xff]   ;;  %v1389_v37 = vld [vmem:[%s1760_s3 + $0x48] sm:$0xff]   ;;  %v1390_v38 = vld [vmem:[%s1760_s3 + $0x50] sm:$0xff]  }
   0xe   : > { %s1155_s11 = sshll.u32 %s1769_s14, 2  ;;  %v1391_v39 = vld [vmem:[%s1760_s3 + $0x58] sm:$0xff]   ;;  %v1157_v40 = vld [vmem:[%s1759_s2] ss:$0 sm:$0xff]  ;;  %v1393_v45 = vld [vmem:[%s1762_s5 + $0x8] sm:$0xff]   ;;  %s363_s17 = scalar_lea.vmem %s1767_s10, %s1769_s14 }
   0xf   : > { %s356_s15 = scalar_lea.vmem %s1757_s0, %s1155_s11  ;;  %586 = vmatpush1.bf16.msra.mxu1 %v1381_v29  ;;  %v1392_v41 = vld [vmem:[%s1762_s5] sm:$0xff]   ;;  %v1394_v48 = vld [vmem:[%s1762_s5 + $0x10] sm:$0xff]   ;;  %v1395_v53 = vld [vmem:[%s1762_s5 + $0x18] sm:$0xff]   ;;  %s360_s20 = scalar_lea.vmem %s1766_s9, %s1155_s11 }
  0x10   : > { %1351 = vmatpush3.bf16.msra.mxu0 %v1350_v11  ;;  %v365_v26 = vld [vmem:[%s356_s15] sm:$0xf]  ;;  %587 = vmatprep.subr.bf16.mxu1 %v1441_v28  ;;  %v1397_v55 = vld [vmem:[%s1762_s5 + $0x28] sm:$0xff]   ;;  %v1398_v59 = vld [vmem:[%s1762_s5 + $0x30] sm:$0xff]  }
  0x11   : > { %1352 = vmatprep.subr.bf16.mxu0 %v1438_v3  ;;  %v1396_v54 = vld [vmem:[%s1762_s5 + $0x20] sm:$0xff]   ;;  %v1399_v60 = vld [vmem:[%s1762_s5 + $0x38] sm:$0xff]   ;;  %v1403_v63 = vld [vmem:[%s1764_s7 + $0x48] sm:$0xff]  }
  0x12   : > { %v1400_v61 = vld [vmem:[%s1764_s7 + $0x40] sm:$0xff]   ;;  %v1405_v0 = vld [vmem:[%s1764_s7 + $0x8] sm:$0xff]   ;;  %v1406_v1 = vld [vmem:[%s1764_s7 + $0x50] sm:$0xff]  }
  0x13   : > { %588 = vmatpush1.bf16.msra.mxu1 %v1382_v30  ;;  %v1402_v62 = vld [vmem:[%s1764_s7] sm:$0xff]   ;;  %v1408_v2 = vld [vmem:[%s1764_s7 + $0x10] sm:$0xff]   ;;  %v1411_v4 = vld [vmem:[%s1764_s7 + $0x18] sm:$0xff]  }
  0x14   : > { %1354 = vmatpush3.bf16.msra.mxu0 %v1353_v15  ;;  %589 = vmatprep.subr.bf16.mxu1 %v1441_v28  ;;  %v1412_v5 = vld [vmem:[%s1764_s7 + $0x60] sm:$0xff]   ;;  %v1404_v17 = vld [vmem:[%s1764_s7 + $0x88] sm:$0xff]   ;;  %v1410_v19 = vld [vmem:[%s1764_s7 + $0x98] sm:$0xff]  }
  0x15   : > { %1355 = vmatprep.subr.bf16.mxu0 %v1438_v3  ;;  %v1414_v7 = vld [vmem:[%s1764_s7 + $0x20] sm:$0xff]   ;;  %v1416_v22 = vld [vmem:[%s1764_s7 + $0xa8] sm:$0xff]   ;;  %v1421_v27 = vld [vmem:[%s1764_s7 + $0x78] sm:$0xff]  }
  0x16   : > { %v1158_v8 = vld [vmem:[%s1761_s4] ss:$0 sm:$0xff]  ;;  %v1417_v23 = vld [vmem:[%s1764_s7 + $0x28] sm:$0xff]   ;;  %v1423_v29 = vld [vmem:[%s1764_s7 + $0x38] sm:$0xff]  }
  0x17   : > { %590 = vmatpush1.bf16.msra.mxu1 %v1383_v31  ;;  %v1401_v15 = vld [vmem:[%s1764_s7 + $0x80] sm:$0xff]   ;;  %vm1206_vm4 = vmpackc.low %vm464_vm2, %vm464_vm2 }
  0x18   : > { %1357 = vmatpush3.bf16.msra.mxu0 %v1356_v18  ;;  %591 = vmatprep.subr.bf16.mxu1 %v1441_v28  ;;  %v1407_v18 = vld [vmem:[%s1764_s7 + $0x90] sm:$0xff]   ;;  %v1413_v20 = vld [vmem:[%s1764_s7 + $0xa0] sm:$0xff]  }
  0x19   : > { %1358 = vmatprep.subr.bf16.mxu0 %v1438_v3  ;;  %v1172_v30 = vld [vmem:[%s1763_s6] ss:$0 sm:$0xff] }
  0x1b   : > { %592 = vmatpush1.bf16.msra.mxu1 %v1384_v32 }
  0x1c   : > { %1360 = vmatpush3.bf16.msra.mxu0 %v1359_v21  ;;  %593 = vmatprep.subr.bf16.mxu1 %v1441_v28  ;;  %v1415_v21 = vld [vmem:[%s1764_s7 + $0x68] sm:$0xff]  }
  0x1d   : > { %1361 = vmatprep.subr.bf16.mxu0 %v1438_v3 }
  0x1f   : > { %594 = vmatpush1.bf16.msra.mxu1 %v1385_v33 }
  0x20   : > { %1363 = vmatpush3.bf16.msra.mxu0 %v1362_v24  ;;  %595 = vmatprep.subr.bf16.mxu1 %v1441_v28  ;;  %v1418_v24 = vld [vmem:[%s1764_s7 + $0x70] sm:$0xff]  }
  0x21   : > { %1364 = vmatprep.subr.bf16.mxu0 %v1438_v3  ;;  %v1409_v3 = vld [vmem:[%s1764_s7 + $0x58] sm:$0xff]  }
  0x23   : > { %596 = vmatpush1.bf16.msra.mxu1 %v1386_v34 }
  0x24   : > { %1366 = vmatpush3.bf16.msra.mxu0 %v1365_v25  ;;  %597 = vmatprep.subr.bf16.mxu1 %v1441_v28  ;;  %v1419_v25 = vld [vmem:[%s1764_s7 + $0xb0] sm:$0xff]  }
  0x25   : > { %1303 = vmatprep.subr.bf16.mxu0 %v1440_v6 }
  0x27   : > { %1301 = vmatmul.mubr.f32.vlgmr.msra.gmra.mrb[0].mxu0 %v365_v26  ;;  %598 = vmatpush1.bf16.msra.mxu1 %v1387_v35  ;;  %v1420_v26 = vld [vmem:[%s1764_s7 + $0x30] sm:$0xff]  }
  0x28   : > { %1319 = vmatprep.mubr.msk.bf16.mxu0 %vm1439_vm0, %v1440_v6  ;;  %599 = vmatprep.subr.bf16.mxu1 %v1441_v28 }
  0x29   : > { %1304 = vmatpush3.bf16.msra.mxu0 %v1392_v41 }
  0x2a   : > { %1305 = vmatprep.subr.bf16.mxu0 %v1440_v6 }
  0x2b   : > { %600 = vmatpush1.bf16.msra.mxu1 %v1388_v36 }
  0x2c   : > { %601 = vmatprep.subr.bf16.mxu1 %v1441_v28 }
  0x2d   : > { %1306 = vmatpush3.bf16.msra.mxu0 %v1393_v45 }
  0x2e   : > { %1307 = vmatprep.subr.bf16.mxu0 %v1440_v6 }
  0x2f   : > { %602 = vmatpush1.bf16.msra.mxu1 %v1389_v37 }
  0x30   : > { %603 = vmatprep.subr.bf16.mxu1 %v1441_v28 }
  0x31   : > { %1308 = vmatpush3.bf16.msra.mxu0 %v1394_v48  ;;  %v1181_v48 = vld [vmem:[%s1765_s8] ss:$0 sm:$0xff] }
  0x32   : > { %1309 = vmatprep.subr.bf16.mxu0 %v1440_v6 }
  0x33   : > { %604 = vmatpush1.bf16.msra.mxu1 %v1390_v38 }
  0x34   : > { %605 = vmatprep.subr.bf16.mxu1 %v1441_v28  ;;  %v1422_v28 = vld [vmem:[%s1764_s7 + $0xb8] sm:$0xff]  }
  0x35   : > { %1310 = vmatpush3.bf16.msra.mxu0 %v1395_v53 }
  0x36   : > { %1311 = vmatprep.subr.bf16.mxu0 %v1440_v6 }
  0x37   : > { %606 = vmatpush1.bf16.msra.mxu1 %v1391_v39 }
  0x38   : > { %1237 = vmatprep.subr.bf16.mxu1 %v1400_v61 }
  0x39   : > { %1312 = vmatpush3.bf16.msra.mxu0 %v1396_v54 }
  0x3a   : > { %1313 = vmatprep.subr.bf16.mxu0 %v1440_v6 }
  0x3d   : > { %1314 = vmatpush3.bf16.msra.mxu0 %v1397_v55 }
  0x3e   : > { %1315 = vmatprep.subr.bf16.mxu0 %v1440_v6 }
  0x41   : > { %1316 = vmatpush3.bf16.msra.mxu0 %v1398_v59 }
  0x42   : > { %1317 = vmatprep.subr.bf16.mxu0 %v1440_v6 }
  0x45   : > { %1318 = vmatpush3.bf16.msra.mxu0 %v1399_v60 }
  0x46   : > { %1323 = vmatprep.subr.bf16.mxu0 %v1440_v6 }
  0xfa   : > { %v455_v42 = vpop.f32.mrb[0].mxu0 }
  0xfb   : > { %v1609_v43 = vadd.f32 %v1157_v40, %v455_v42  ;;  %v1302_v44 = vpop.f32.mrb[1].mxu0 }
  0xfd   : > { %v460_v46 = vrot.slane %v1609_v43, 7 }
  0xff   : > { %v463_v47 = vsel %vm462_vm1, 0.0, %v460_v46 }
 0x100   : > { %v465_v49 = vsel %vm464_vm2, %v463_v47, 0.0 }
 0x101   : > { %v467_v50 = vrot.slane %v465_v49, 1  ;;  %v471_v51 = vrot.slane %v465_v49, 2 }
 0x103   : > { %468 = vrot.lane.b32.xlu0 %v467_v50, %s1442_s12  ;;  %v476_v52 = vpack.c.bf16 %v471_v51, %v471_v51 }
 0x105   : > { %1171 = vmatprep.mubr.msk.bf16.mxu1 %vm473_vm3, %v476_v52 }
 0x175   : > { %v469_v56 = vpop.permute.xlu0 %468 }
 0x176   : > { %v474_v57 = vsel %vm473_vm3, %v465_v49, %v469_v56 }
 0x177   : > { %v475_v58 = vpack.c.bf16 %v474_v57, %v474_v57 }
 0x179   : > { %616 = vmatmul.mubr.bf16.vlgmr.msra.gmra.mrb[0].mxu1 %v475_v58 }
 0x17a   : > { %1238 = vmatpush3.bf16.msra.mxu1 %v1402_v62 }
 0x17b   : > { %1239 = vmatprep.subr.bf16.mxu1 %v1403_v63 }
 0x17e   : > { %1240 = vmatpush3.bf16.msra.mxu1 %v1405_v0 }
 0x17f   : > { %1241 = vmatprep.subr.bf16.mxu1 %v1406_v1 }
 0x182   : > { %1242 = vmatpush3.bf16.msra.mxu1 %v1408_v2 }
 0x183   : > { %1243 = vmatprep.subr.bf16.mxu1 %v1409_v3 }
 0x186   : > { %1244 = vmatpush3.bf16.msra.mxu1 %v1411_v4 }
 0x187   : > { %1245 = vmatprep.subr.bf16.mxu1 %v1412_v5 }
 0x18a   : > { %1246 = vmatpush3.bf16.msra.mxu1 %v1414_v7 }
 0x18b   : > { %1247 = vmatprep.subr.bf16.mxu1 %v1415_v21 }
 0x18e   : > { %1248 = vmatpush3.bf16.msra.mxu1 %v1417_v23 }
 0x18f   : > { %1249 = vmatprep.subr.bf16.mxu1 %v1418_v24 }
 0x192   : > { %1250 = vmatpush3.bf16.msra.mxu1 %v1420_v26 }
 0x193   : > { %1251 = vmatprep.subr.bf16.mxu1 %v1421_v27 }
 0x196   : > { %1252 = vmatpush3.bf16.msra.mxu1 %v1423_v29 }
 0x24c   : > { %v617_v9 = vpop.f32.mrb[0].mxu1 }
 0x24d   : > { %v618_v10 = vadd.f32 %v1158_v8, %v617_v9  ;;  %v619_v11 = vpop.f32.mrb[1].mxu1 }
 0x24e   : > { %v620_v12 = vpop.f32.mrb[2].mxu1 }
 0x24f   : > { %v623_v13 = vmax.f32 %v618_v10, 0.0  ;;  %v621_v14 = vpop.f32.mrb[3].mxu1 }
 0x251   : > { %v624_v16 = vpack.c.bf16 %v623_v13, %v623_v13 }
 0x253   : > { %1320 = vmatmul.mubr.bf16.vlgmr.msra.gmra.mrb[4].mxu0 %v624_v16 }
 0x254   : > { %1324 = vmatpush3.bf16.msra.mxu0 %v1401_v15  ;;  %1339 = vmatprep.mubr.msk.bf16.mxu0 %vm1439_vm0, %v1440_v6 }
 0x255   : > { %1325 = vmatprep.subr.bf16.mxu0 %v1440_v6 }
 0x258   : > { %1326 = vmatpush3.bf16.msra.mxu0 %v1404_v17 }
 0x259   : > { %1327 = vmatprep.subr.bf16.mxu0 %v1440_v6 }
 0x25c   : > { %1328 = vmatpush3.bf16.msra.mxu0 %v1407_v18 }
 0x25d   : > { %1329 = vmatprep.subr.bf16.mxu0 %v1440_v6 }
 0x260   : > { %1330 = vmatpush3.bf16.msra.mxu0 %v1410_v19 }
 0x261   : > { %1331 = vmatprep.subr.bf16.mxu0 %v1440_v6 }
 0x264   : > { %1332 = vmatpush3.bf16.msra.mxu0 %v1413_v20 }
 0x265   : > { %1333 = vmatprep.subr.bf16.mxu0 %v1440_v6 }
 0x268   : > { %1334 = vmatpush3.bf16.msra.mxu0 %v1416_v22 }
 0x269   : > { %1335 = vmatprep.subr.bf16.mxu0 %v1440_v6 }
 0x26c   : > { %1336 = vmatpush3.bf16.msra.mxu0 %v1419_v25 }
 0x26d   : > { %1337 = vmatprep.subr.bf16.mxu0 %v1440_v6 }
 0x270   : > { %1338 = vmatpush3.bf16.msra.mxu0 %v1422_v28 }
 0x326   : > { %v730_v6 = vpop.f32.mrb[4].mxu0 }
 0x327   : > { %v731_v31 = vadd.f32 %v1172_v30, %v730_v6  ;;  %v1321_v32 = vpop.f32.mrb[5].mxu0 }
 0x328   : > { %v733_v33 = vpop.f32.mrb[6].mxu0 }
 0x329   : > { %v736_v34 = vmax.f32 %v731_v31, 0.0  ;;  %v1322_v35 = vpop.f32.mrb[7].mxu0 }
 0x32b   : > { %v738_v36 = vrot.slane %v736_v34, 7 }
 0x32d   : > { %v740_v37 = vsel %vm462_vm1, 0.0, %v738_v36 }
 0x32e   : > { %v741_v38 = vsel %vm464_vm2, %v740_v37, 0.0  ;;  %v1207_v44 = vpack.c.bf16 %v740_v37, %v740_v37 }
 0x32f   : > { %v745_v39 = vrot.slane %v741_v38, 2  ;;  %v743_v40 = vrot.slane %v741_v38, 1 }
 0x331   : > { %v749_v41 = vpack.c.bf16 %v745_v39, %v745_v39  ;;  %v748_v42 = vpack.c.bf16 %v743_v40, %v743_v40 }
 0x333   : > { %981 = vmatprep.mubr.bf16.mxu1 %v748_v42  ;;  %1340 = vmatmul.mubr.bf16.vlgmr.msra.gmra.mrb[8].mxu0 %v749_v41 }
 0x334   : > { %1208 = vmatmul.mubr.msk.bf16.vlgmr.msra.gmra.mrb[4].mxu1 %vm1206_vm4, %v1207_v44 }
 0x406   : > { %v1023_v45 = vpop.f32.mrb[8].mxu0 }
 0x407   : > { %v1253_v46 = vpop.f32.mrb[4].mxu1  ;;  %v1341_v47 = vpop.f32.mrb[9].mxu0 }
 0x408   : > { %v1254_v49 = vpop.f32.mrb[5].mxu1  ;;  %v1026_v50 = vpop.f32.mrb[10].mxu0 }
 0x409   : > { %v1255_v51 = vadd.f32 %v1254_v49, %v1253_v46  ;;  %v1256_v52 = vpop.f32.mrb[6].mxu1  ;;  %v1342_v53 = vpop.f32.mrb[11].mxu0 }
 0x40a   : > { %v1257_v54 = vpop.f32.mrb[7].mxu1 }
 0x40b   : > { %v984_v55 = vadd.f32 %v1255_v51, %v1181_v48 }
 0x40d   : > { %v1024_v56 = vadd.f32 %v1023_v45, %v984_v55 }
 0x40f   : > { %v1047_v57 = vadd.f32 %v1024_v56, %v1609_v43  ;;  %v1029_v58 = vadd.f32 2.0, %v1024_v56 }
 0x411   : > { %1049 = vrot.lane.b32.xlu0 %v1047_v57, %s1442_s12  ;;  %v1031_v59 = vand.u32 2147483647, %v1029_v58  ;;  %v1030_v7 = vmin.f32 %v1029_v58, 0.0 }
 0x413   : > { %v1032_v60 = vsub.f32 0.0, %v1031_v59 }
 0x415   : > { %v1033_v61 = vmul.f32 1.442695, %v1032_v60 }
 0x417   : > { %1424 = vpow2.f32 %v1033_v61 }
 0x421   : > { %v1425_v62 = vpop.eup %1424 }
 0x422   : > { %v1035_v63 = vadd.f32 1.0, %v1425_v62  ;;  %v1038_v0 = vmul.f32 -0.5, %v1425_v62  ;;  %v1041_v2 = vand.u32 2147483647, %v1425_v62 }
 0x424   : > { %1426 = vlog2.f32 %v1035_v63  ;;  %v1039_v1 = vadd.f32 1.0, %v1038_v0  ;;  %vm1042_vm5 = vcmp.lt.f32.partialorder %v1041_v2, 0.0004427343 }
 0x426   : > { %v1040_v5 = vmul.f32 %v1425_v62, %v1039_v1 }
 0x42e   : > { %v1427_v3 = vpop.eup %1426 }
 0x42f   : > { %v1037_v4 = vmul.f32 0.6931472, %v1427_v3 }
 0x431   : > { %v1043_v8 = vsel %vm1042_vm5, %v1040_v5, %v1037_v4 }
 0x432   : > { %v1044_v9 = vsub.f32 %v1030_v7, %v1043_v8 }
 0x434   : > { %v1054_v10 = vsel %vm1053_vm6, %v1044_v9, 0.0  ;;  %v1045_v11 = vmul.f32 1.442695, %v1044_v9 }
 0x435   : > { %1055 = vadd.xlane.f32.xlu1 %v1054_v10 }
 0x436   : > { %1428 = vpow2.f32 %v1045_v11 }
 0x440   : > { %v1429_v12 = vpop.eup %1428 }
 0x483   : > { %v1050_v13 = vpop.permute.xlu0 %1049 }
 0x484   : > { %v1052_v14 = vmul.f32 %v1429_v12, %v1050_v13 }
 0x486   : > { %1067 = vrot.lane.b32.xlu1 %v1052_v14, %s1442_s12 }
 0x4c2   : > { %v1056_v15 = vpop.xlane.xlu1 %1055 }
 0x4c3   : > { %v1058_v16 = vsel %vm1057_vm7, %v1056_v15, 0.0 }
 0x4c4   : > { %v1059_v17 = vrot.slane %v1058_v16, 4 }
 0x4c6   : > { %v1060_v18 = vadd.f32 %v1059_v17, %v1058_v16 }
 0x4c8   : > { %v1061_v19 = vrot.slane %v1060_v18, 2 }
 0x4ca   : > { %v1062_v20 = vadd.f32 %v1061_v19, %v1060_v18 }
 0x4cc   : > { %v1063_v21 = vrot.slane %v1062_v20, 1 }
 0x4ce   : > { %v1064_v22 = vadd.f32 %v1063_v21, %v1062_v20 }
 0x4d0   : > { %1065 = vst [vmem:[%s363_s17] sm:$0x1] %v1064_v22 }
 0x4f8   : > { %v1068_v23 = vpop.permute.xlu1 %1067 }
 0x4f9   : > { %v1070_v24 = vsel %vm473_vm3, %v1609_v43, %v1068_v23 }
 0x4fa   : > { %1071 = vst [vmem:[%s360_s20] sm:$0xf] %v1070_v24 }
 0x4fb PF: > { %s21_s13 = sadd.s32 1, %s1436_s13  }
 0x4fc   : > { %p18_p4 = scmp.ge.s32.totalorder %s21_s13, 4  }
 0x4fe   :  { %20 = sbr.rel (!%p18_p4) target bundleno = 1 (0x1), region = 98 }

</bundles_post_ra>
